<compile_context>
chip_gen: v5e
topology: v5e:2x2
jax: 0.10.0
libtpu: 0.0.40
codegen_flags: <defaults>
</compile_context>

<pallas_src>
import jax
import jax.numpy as jnp
from jax import lax
from jax.experimental import pallas as pl
from jax.experimental.pallas import tpu as pltpu


# ----------------------------------------------------------------------------
# Kernel: one (n, d) output plane per grid step.
#   inputs : 3 halo planes of padded x, (H+2, W+2, C) each   [same HBM array]
#            w1 packed as (3, 9*C, Cr)   ((kd) x (kh,kw,c)-major x (o))
#            w2 as (Cr, C)
#   scratch: patch matrix (H*W, 9*C)  -- in-VMEM im2col for one kd slab
#   output : (H*W, C) residual-added plane
# ----------------------------------------------------------------------------
def _make_residual_kernel(H, W, C, Cr, compute_dtype):
    HW = H * W

    def kernel(p0_ref, p1_ref, p2_ref, w1_ref, w2_ref, o_ref, patch_ref):
        # Raw (un-activated) center plane -- needed for the residual add.
        p1_raw = p1_ref[...]                                   # (H+2, W+2, C) f32

        # ReLU once per loaded plane (3x per x element, not 27x).  Zero padding
        # is a ReLU fixed point, so ReLU(pad(x)) == pad(ReLU(x)).
        planes = (
            jnp.maximum(p0_ref[...], 0.0).astype(compute_dtype),
            jnp.maximum(p1_raw, 0.0).astype(compute_dtype),
            jnp.maximum(p2_ref[...], 0.0).astype(compute_dtype),
        )

        # 3x3x3 conv == 3 matmuls (one per kd) with contraction K = 9*C.
        # For each kd, lay the nine (kh,kw)-shifted windows side by side in a
        # VMEM patch buffer, then contract against the matching (9C, Cr) slab.
        acc = jnp.zeros((HW, Cr), dtype=jnp.float32)
        for kd in range(3):
            p = planes[kd]
            for kh in range(3):
                for kw in range(3):
                    idx = kh * 3 + kw
                    patch_ref[:, idx * C:(idx + 1) * C] = (
                        p[kh:kh + H, kw:kw + W, :].reshape(HW, C))
            acc = acc + jnp.dot(patch_ref[...],
                                w1_ref[kd].astype(compute_dtype),
                                preferred_element_type=jnp.float32)

        h = jnp.maximum(acc, 0.0)                              # ReLU
        y = jnp.dot(h.astype(compute_dtype),
                    w2_ref[...].astype(compute_dtype),
                    preferred_element_type=jnp.float32)        # 1x1x1 conv

        x_center = p1_raw[1:1 + H, 1:1 + W, :].reshape(HW, C)  # original x
        o_ref[...] = x_center + y                              # residual add

    return kernel


def residual_layer_pallas(x_ncdhw, w1, w2, *, compute_dtype=jnp.float32):
    """x_ncdhw: (N, C, D, H, W) f32.  w1: (Cr, C, 3, 3, 3).  w2: (C, Cr, 1, 1, 1)."""
    N, C, D, H, W = x_ncdhw.shape
    Cr = w1.shape[0]
    assert w1.shape == (Cr, C, 3, 3, 3)
    assert w2.shape == (C, Cr, 1, 1, 1)
    HW = H * W

    # --- glue: layout change + spatial zero pad (no HBM im2col) --------------
    x_ndhwc = jnp.transpose(x_ncdhw, (0, 2, 3, 4, 1))                # (N, D, H, W, C)
    xp = jnp.pad(x_ndhwc, ((0, 0), (1, 1), (1, 1), (1, 1), (0, 0)))  # (N, D+2, H+2, W+2, C)

    # Weight layouts:
    #  w1 -> (kd, kh, kw, c_in, c_out) -> (3, 9*C, Cr); row (kh*3+kw)*C + c
    #  matches the patch-matrix column order built in the kernel.
    w1_k = jnp.transpose(w1, (2, 3, 4, 1, 0)).reshape(3, 9 * C, Cr)
    w2_mat = jnp.transpose(w2[:, :, 0, 0, 0], (1, 0))                # (Cr, C)

    def plane_spec(kd):
        # Halo plane d+kd of sample n; N and D dims squeezed out of the kernel ref.
        return pl.BlockSpec((None, None, H + 2, W + 2, C),
                            lambda n, d, kd=kd: (n, d + kd, 0, 0, 0))

    grid_spec = pltpu.PrefetchScalarGridSpec(
        num_scalar_prefetch=0,
        grid=(N, D),
        in_specs=[
            plane_spec(0),
            plane_spec(1),
            plane_spec(2),
            pl.BlockSpec((3, 9 * C, Cr), lambda n, d: (0, 0, 0)),    # resident weights
            pl.BlockSpec((Cr, C), lambda n, d: (0, 0)),              # resident weights
        ],
        out_specs=pl.BlockSpec((None, None, HW, C), lambda n, d: (n, d, 0, 0)),
        scratch_shapes=[pltpu.VMEM((HW, 9 * C), compute_dtype)],     # patch matrix
    )

    out_rows = pl.pallas_call(
        _make_residual_kernel(H, W, C, Cr, compute_dtype),
        out_shape=jax.ShapeDtypeStruct((N, D, HW, C), jnp.float32),
        grid_spec=grid_spec,
        compiler_params=pltpu.CompilerParams(
            dimension_semantics=("parallel", "parallel")),
    )(xp, xp, xp, w1_k, w2_mat)

    out_ndhwc = out_rows.reshape(N, D, H, W, C)
    return jnp.transpose(out_ndhwc, (0, 4, 1, 2, 3))                 # back to NCDHW


# ----------------------------------------------------------------------------
# Pure-JAX reference (lax conv) for correctness checking.
# ----------------------------------------------------------------------------
def residual_layer_ref(x, w1, w2):
    dn = lax.conv_dimension_numbers(x.shape, w1.shape, ("NCDHW", "OIDHW", "NCDHW"))
    y = jnp.maximum(x, 0.0)
    y = lax.conv_general_dilated(y, w1, window_strides=(1, 1, 1),
                                 padding=[(1, 1)] * 3, dimension_numbers=dn)
    y = jnp.maximum(y, 0.0)
    y = lax.conv_general_dilated(y, w2, window_strides=(1, 1, 1),
                                 padding=[(0, 0)] * 3, dimension_numbers=dn)
    return x + y


if __name__ == "__main__":
    # Small, self-consistent shapes: in_dim == res_h_dim == 4 (required for the
    # residual add to be well-defined), N=2, D=H=W=8.
    N, C, D, H, W = 2, 4, 8, 8, 8
    Cr = C  # res_h_dim

    key = jax.random.PRNGKey(0)
    kx, k1, k2 = jax.random.split(key, 3)

    x = jax.random.normal(kx, (N, C, D, H, W), dtype=jnp.float32)

    # Deterministic kaiming_normal_ init (gain=sqrt(2), std = gain/sqrt(fan_in))
    fan_in1 = C * 3 * 3 * 3
    fan_in2 = Cr * 1 * 1 * 1
    w1 = jax.random.normal(k1, (Cr, C, 3, 3, 3), dtype=jnp.float32) * jnp.sqrt(2.0 / fan_in1)
    w2 = jax.random.normal(k2, (C, Cr, 1, 1, 1), dtype=jnp.float32) * jnp.sqrt(2.0 / fan_in2)

    out = jax.jit(residual_layer_pallas)(x, w1, w2)
    out = jax.block_until_ready(out)

    ref = jax.block_until_ready(residual_layer_ref(x, w1, w2))

    assert out.shape == (N, C, D, H, W)
    err = float(jnp.max(jnp.abs(out - ref)))
    assert jnp.allclose(out, ref, rtol=1e-3, atol=1e-3), err

    print("KERNEL_OK")
</pallas_src>

<mosaic_0001>
module attributes {stable_mosaic.version = 11 : i64} {
  func.func @kernel(%arg0: i32, %arg1: i32, %arg2: memref<1x1x10x10x4xf32, #tpu.memory_space<vmem>>, %arg3: memref<1x1x10x10x4xf32, #tpu.memory_space<vmem>>, %arg4: memref<1x1x10x10x4xf32, #tpu.memory_space<vmem>>, %arg5: memref<3x36x4xf32, #tpu.memory_space<vmem>>, %arg6: memref<4x4xf32, #tpu.memory_space<vmem>>, %arg7: memref<1x1x64x4xf32, #tpu.memory_space<vmem>>, %arg8: memref<64x36xf32, #tpu.memory_space<vmem>>) attributes {dimension_semantics = [#tpu.dimension_semantics<parallel>, #tpu.dimension_semantics<parallel>], iteration_bounds = array<i64: 2, 8>, scalar_prefetch = 0 : i64, scratch_operands = 1 : i64, tpu.core_type = #tpu.core_type<tc>, window_params = [{transform_indices = @transform_0, window_bounds = array<i64: 1, 1, 10, 10, 4>}, {transform_indices = @transform_1, window_bounds = array<i64: 1, 1, 10, 10, 4>}, {transform_indices = @transform_2, window_bounds = array<i64: 1, 1, 10, 10, 4>}, {pipeline_mode = #tpu.pipeline_mode<synchronous>, transform_indices = @transform_3, window_bounds = array<i64: 3, 36, 4>}, {pipeline_mode = #tpu.pipeline_mode<synchronous>, transform_indices = @transform_4, window_bounds = array<i64: 4, 4>}, {transform_indices = @transform_5, window_bounds = array<i64: 1, 1, 64, 4>}]} {
    %c0 = arith.constant 0 : index
    %c0_0 = arith.constant 0 : index
    %c0_1 = arith.constant 0 : index
    %c0_2 = arith.constant 0 : index
    %c0_3 = arith.constant 0 : index
    %0 = vector.load %arg3[%c0, %c0_0, %c0_1, %c0_2, %c0_3] : memref<1x1x10x10x4xf32, #tpu.memory_space<vmem>>, vector<1x1x10x10x4xf32>
    %1 = vector.shape_cast %0 : vector<1x1x10x10x4xf32> to vector<10x10x4xf32>
    %c0_4 = arith.constant 0 : index
    %c0_5 = arith.constant 0 : index
    %c0_6 = arith.constant 0 : index
    %c0_7 = arith.constant 0 : index
    %c0_8 = arith.constant 0 : index
    %2 = vector.load %arg2[%c0_4, %c0_5, %c0_6, %c0_7, %c0_8] : memref<1x1x10x10x4xf32, #tpu.memory_space<vmem>>, vector<1x1x10x10x4xf32>
    %3 = vector.shape_cast %2 : vector<1x1x10x10x4xf32> to vector<10x10x4xf32>
    %cst = arith.constant 0.000000e+00 : f32
    %4 = vector.broadcast %cst : f32 to vector<10x10x4xf32>
    %5 = arith.maximumf %3, %4 : vector<10x10x4xf32>
    %cst_9 = arith.constant 0.000000e+00 : f32
    %6 = vector.broadcast %cst_9 : f32 to vector<10x10x4xf32>
    %7 = arith.maximumf %1, %6 : vector<10x10x4xf32>
    %c0_10 = arith.constant 0 : index
    %c0_11 = arith.constant 0 : index
    %c0_12 = arith.constant 0 : index
    %c0_13 = arith.constant 0 : index
    %c0_14 = arith.constant 0 : index
    %8 = vector.load %arg4[%c0_10, %c0_11, %c0_12, %c0_13, %c0_14] : memref<1x1x10x10x4xf32, #tpu.memory_space<vmem>>, vector<1x1x10x10x4xf32>
    %9 = vector.shape_cast %8 : vector<1x1x10x10x4xf32> to vector<10x10x4xf32>
    %cst_15 = arith.constant 0.000000e+00 : f32
    %10 = vector.broadcast %cst_15 : f32 to vector<10x10x4xf32>
    %11 = arith.maximumf %9, %10 : vector<10x10x4xf32>
    %cst_16 = arith.constant 0.000000e+00 : f32
    %12 = vector.broadcast %cst_16 : f32 to vector<64x4xf32>
    %13 = vector.extract_strided_slice %5 {offsets = [0, 0, 0], sizes = [8, 8, 4], strides = [1, 1, 1]} : vector<10x10x4xf32> to vector<8x8x4xf32>
    %14 = vector.shape_cast %13 : vector<8x8x4xf32> to vector<64x4xf32>
    %c0_17 = arith.constant 0 : index
    %c0_18 = arith.constant 0 : index
    %15 = vector.load %arg8[%c0_17, %c0_18] : memref<64x36xf32, #tpu.memory_space<vmem>>, vector<64x4xf32>
    tpu.vector_store %arg8[%c0_17, %c0_18], %14 {strides = array<i32>} : memref<64x36xf32, #tpu.memory_space<vmem>>, vector<64x4xf32>,
    %16 = vector.extract_strided_slice %5 {offsets = [0, 1, 0], sizes = [8, 8, 4], strides = [1, 1, 1]} : vector<10x10x4xf32> to vector<8x8x4xf32>
    %17 = vector.shape_cast %16 : vector<8x8x4xf32> to vector<64x4xf32>
    %c0_19 = arith.constant 0 : index
    %c4 = arith.constant 4 : index
    %18 = vector.load %arg8[%c0_19, %c4] : memref<64x36xf32, #tpu.memory_space<vmem>>, vector<64x4xf32>
    tpu.vector_store %arg8[%c0_19, %c4], %17 {strides = array<i32>} : memref<64x36xf32, #tpu.memory_space<vmem>>, vector<64x4xf32>,
    %19 = vector.extract_strided_slice %5 {offsets = [0, 2, 0], sizes = [8, 8, 4], strides = [1, 1, 1]} : vector<10x10x4xf32> to vector<8x8x4xf32>
    %20 = vector.shape_cast %19 : vector<8x8x4xf32> to vector<64x4xf32>
    %c0_20 = arith.constant 0 : index
    %c8 = arith.constant 8 : index
    %21 = vector.load %arg8[%c0_20, %c8] : memref<64x36xf32, #tpu.memory_space<vmem>>, vector<64x4xf32>
    tpu.vector_store %arg8[%c0_20, %c8], %20 {strides = array<i32>} : memref<64x36xf32, #tpu.memory_space<vmem>>, vector<64x4xf32>,
    %22 = vector.extract_strided_slice %5 {offsets = [1, 0, 0], sizes = [8, 8, 4], strides = [1, 1, 1]} : vector<10x10x4xf32> to vector<8x8x4xf32>
    %23 = vector.shape_cast %22 : vector<8x8x4xf32> to vector<64x4xf32>
    %c0_21 = arith.constant 0 : index
    %c12 = arith.constant 12 : index
    %24 = vector.load %arg8[%c0_21, %c12] : memref<64x36xf32, #tpu.memory_space<vmem>>, vector<64x4xf32>
    tpu.vector_store %arg8[%c0_21, %c12], %23 {strides = array<i32>} : memref<64x36xf32, #tpu.memory_space<vmem>>, vector<64x4xf32>,
    %25 = vector.extract_strided_slice %5 {offsets = [1, 1, 0], sizes = [8, 8, 4], strides = [1, 1, 1]} : vector<10x10x4xf32> to vector<8x8x4xf32>
    %26 = vector.shape_cast %25 : vector<8x8x4xf32> to vector<64x4xf32>
    %c0_22 = arith.constant 0 : index
    %c16 = arith.constant 16 : index
    %27 = vector.load %arg8[%c0_22, %c16] : memref<64x36xf32, #tpu.memory_space<vmem>>, vector<64x4xf32>
    tpu.vector_store %arg8[%c0_22, %c16], %26 {strides = array<i32>} : memref<64x36xf32, #tpu.memory_space<vmem>>, vector<64x4xf32>,
    %28 = vector.extract_strided_slice %5 {offsets = [1, 2, 0], sizes = [8, 8, 4], strides = [1, 1, 1]} : vector<10x10x4xf32> to vector<8x8x4xf32>
    %29 = vector.shape_cast %28 : vector<8x8x4xf32> to vector<64x4xf32>
    %c0_23 = arith.constant 0 : index
    %c20 = arith.constant 20 : index
    %30 = vector.load %arg8[%c0_23, %c20] : memref<64x36xf32, #tpu.memory_space<vmem>>, vector<64x4xf32>
    tpu.vector_store %arg8[%c0_23, %c20], %29 {strides = array<i32>} : memref<64x36xf32, #tpu.memory_space<vmem>>, vector<64x4xf32>,
    %31 = vector.extract_strided_slice %5 {offsets = [2, 0, 0], sizes = [8, 8, 4], strides = [1, 1, 1]} : vector<10x10x4xf32> to vector<8x8x4xf32>
    %32 = vector.shape_cast %31 : vector<8x8x4xf32> to vector<64x4xf32>
    %c0_24 = arith.constant 0 : index
    %c24 = arith.constant 24 : index
    %33 = vector.load %arg8[%c0_24, %c24] : memref<64x36xf32, #tpu.memory_space<vmem>>, vector<64x4xf32>
    tpu.vector_store %arg8[%c0_24, %c24], %32 {strides = array<i32>} : memref<64x36xf32, #tpu.memory_space<vmem>>, vector<64x4xf32>,
    %34 = vector.extract_strided_slice %5 {offsets = [2, 1, 0], sizes = [8, 8, 4], strides = [1, 1, 1]} : vector<10x10x4xf32> to vector<8x8x4xf32>
    %35 = vector.shape_cast %34 : vector<8x8x4xf32> to vector<64x4xf32>
    %c0_25 = arith.constant 0 : index
    %c28 = arith.constant 28 : index
    %36 = vector.load %arg8[%c0_25, %c28] : memref<64x36xf32, #tpu.memory_space<vmem>>, vector<64x4xf32>
    tpu.vector_store %arg8[%c0_25, %c28], %35 {strides = array<i32>} : memref<64x36xf32, #tpu.memory_space<vmem>>, vector<64x4xf32>,
    %37 = vector.extract_strided_slice %5 {offsets = [2, 2, 0], sizes = [8, 8, 4], strides = [1, 1, 1]} : vector<10x10x4xf32> to vector<8x8x4xf32>
    %38 = vector.shape_cast %37 : vector<8x8x4xf32> to vector<64x4xf32>
    %c0_26 = arith.constant 0 : index
    %c32 = arith.constant 32 : index
    %39 = vector.load %arg8[%c0_26, %c32] : memref<64x36xf32, #tpu.memory_space<vmem>>, vector<64x4xf32>
    tpu.vector_store %arg8[%c0_26, %c32], %38 {strides = array<i32>} : memref<64x36xf32, #tpu.memory_space<vmem>>, vector<64x4xf32>,
    %c0_27 = arith.constant 0 : index
    %c0_28 = arith.constant 0 : index
    %40 = vector.load %arg8[%c0_27, %c0_28] : memref<64x36xf32, #tpu.memory_space<vmem>>, vector<64x36xf32>
    %c0_29 = arith.constant 0 : index
    %c0_30 = arith.constant 0 : index
    %c0_31 = arith.constant 0 : index
    %41 = vector.load %arg5[%c0_29, %c0_30, %c0_31] : memref<3x36x4xf32, #tpu.memory_space<vmem>>, vector<1x36x4xf32>
    %42 = vector.shape_cast %41 : vector<1x36x4xf32> to vector<36x4xf32>
    %cst_32 = arith.constant dense<0.000000e+00> : vector<64x4xf32>
    %43 = tpu.matmul %40, %42, %cst_32 {dimension_numbers = #tpu.dot_dimension_numbers<[1], [0], [0], [1], [0, 0, 1, 1], [], []>} : vector<64x36xf32>, vector<36x4xf32>, vector<64x4xf32> -> vector<64x4xf32>
    %44 = arith.addf %12, %43 : vector<64x4xf32>
    %45 = vector.extract_strided_slice %7 {offsets = [0, 0, 0], sizes = [8, 8, 4], strides = [1, 1, 1]} : vector<10x10x4xf32> to vector<8x8x4xf32>
    %46 = vector.shape_cast %45 : vector<8x8x4xf32> to vector<64x4xf32>
    %c0_33 = arith.constant 0 : index
    %c0_34 = arith.constant 0 : index
    %47 = vector.load %arg8[%c0_33, %c0_34] : memref<64x36xf32, #tpu.memory_space<vmem>>, vector<64x4xf32>
    tpu.vector_store %arg8[%c0_33, %c0_34], %46 {strides = array<i32>} : memref<64x36xf32, #tpu.memory_space<vmem>>, vector<64x4xf32>,
    %48 = vector.extract_strided_slice %7 {offsets = [0, 1, 0], sizes = [8, 8, 4], strides = [1, 1, 1]} : vector<10x10x4xf32> to vector<8x8x4xf32>
    %49 = vector.shape_cast %48 : vector<8x8x4xf32> to vector<64x4xf32>
    %c0_35 = arith.constant 0 : index
    %c4_36 = arith.constant 4 : index
    %50 = vector.load %arg8[%c0_35, %c4_36] : memref<64x36xf32, #tpu.memory_space<vmem>>, vector<64x4xf32>
    tpu.vector_store %arg8[%c0_35, %c4_36], %49 {strides = array<i32>} : memref<64x36xf32, #tpu.memory_space<vmem>>, vector<64x4xf32>,
    %51 = vector.extract_strided_slice %7 {offsets = [0, 2, 0], sizes = [8, 8, 4], strides = [1, 1, 1]} : vector<10x10x4xf32> to vector<8x8x4xf32>
    %52 = vector.shape_cast %51 : vector<8x8x4xf32> to vector<64x4xf32>
    %c0_37 = arith.constant 0 : index
    %c8_38 = arith.constant 8 : index
    %53 = vector.load %arg8[%c0_37, %c8_38] : memref<64x36xf32, #tpu.memory_space<vmem>>, vector<64x4xf32>
    tpu.vector_store %arg8[%c0_37, %c8_38], %52 {strides = array<i32>} : memref<64x36xf32, #tpu.memory_space<vmem>>, vector<64x4xf32>,
    %54 = vector.extract_strided_slice %7 {offsets = [1, 0, 0], sizes = [8, 8, 4], strides = [1, 1, 1]} : vector<10x10x4xf32> to vector<8x8x4xf32>
    %55 = vector.shape_cast %54 : vector<8x8x4xf32> to vector<64x4xf32>
    %c0_39 = arith.constant 0 : index
    %c12_40 = arith.constant 12 : index
    %56 = vector.load %arg8[%c0_39, %c12_40] : memref<64x36xf32, #tpu.memory_space<vmem>>, vector<64x4xf32>
    tpu.vector_store %arg8[%c0_39, %c12_40], %55 {strides = array<i32>} : memref<64x36xf32, #tpu.memory_space<vmem>>, vector<64x4xf32>,
    %57 = vector.extract_strided_slice %7 {offsets = [1, 1, 0], sizes = [8, 8, 4], strides = [1, 1, 1]} : vector<10x10x4xf32> to vector<8x8x4xf32>
    %58 = vector.shape_cast %57 : vector<8x8x4xf32> to vector<64x4xf32>
    %c0_41 = arith.constant 0 : index
    %c16_42 = arith.constant 16 : index
    %59 = vector.load %arg8[%c0_41, %c16_42] : memref<64x36xf32, #tpu.memory_space<vmem>>, vector<64x4xf32>
    tpu.vector_store %arg8[%c0_41, %c16_42], %58 {strides = array<i32>} : memref<64x36xf32, #tpu.memory_space<vmem>>, vector<64x4xf32>,
    %60 = vector.extract_strided_slice %7 {offsets = [1, 2, 0], sizes = [8, 8, 4], strides = [1, 1, 1]} : vector<10x10x4xf32> to vector<8x8x4xf32>
    %61 = vector.shape_cast %60 : vector<8x8x4xf32> to vector<64x4xf32>
    %c0_43 = arith.constant 0 : index
    %c20_44 = arith.constant 20 : index
    %62 = vector.load %arg8[%c0_43, %c20_44] : memref<64x36xf32, #tpu.memory_space<vmem>>, vector<64x4xf32>
    tpu.vector_store %arg8[%c0_43, %c20_44], %61 {strides = array<i32>} : memref<64x36xf32, #tpu.memory_space<vmem>>, vector<64x4xf32>,
    %63 = vector.extract_strided_slice %7 {offsets = [2, 0, 0], sizes = [8, 8, 4], strides = [1, 1, 1]} : vector<10x10x4xf32> to vector<8x8x4xf32>
    %64 = vector.shape_cast %63 : vector<8x8x4xf32> to vector<64x4xf32>
    %c0_45 = arith.constant 0 : index
    %c24_46 = arith.constant 24 : index
    %65 = vector.load %arg8[%c0_45, %c24_46] : memref<64x36xf32, #tpu.memory_space<vmem>>, vector<64x4xf32>
    tpu.vector_store %arg8[%c0_45, %c24_46], %64 {strides = array<i32>} : memref<64x36xf32, #tpu.memory_space<vmem>>, vector<64x4xf32>,
    %66 = vector.extract_strided_slice %7 {offsets = [2, 1, 0], sizes = [8, 8, 4], strides = [1, 1, 1]} : vector<10x10x4xf32> to vector<8x8x4xf32>
    %67 = vector.shape_cast %66 : vector<8x8x4xf32> to vector<64x4xf32>
    %c0_47 = arith.constant 0 : index
    %c28_48 = arith.constant 28 : index
    %68 = vector.load %arg8[%c0_47, %c28_48] : memref<64x36xf32, #tpu.memory_space<vmem>>, vector<64x4xf32>
    tpu.vector_store %arg8[%c0_47, %c28_48], %67 {strides = array<i32>} : memref<64x36xf32, #tpu.memory_space<vmem>>, vector<64x4xf32>,
    %69 = vector.extract_strided_slice %7 {offsets = [2, 2, 0], sizes = [8, 8, 4], strides = [1, 1, 1]} : vector<10x10x4xf32> to vector<8x8x4xf32>
    %70 = vector.shape_cast %69 : vector<8x8x4xf32> to vector<64x4xf32>
    %c0_49 = arith.constant 0 : index
    %c32_50 = arith.constant 32 : index
    %71 = vector.load %arg8[%c0_49, %c32_50] : memref<64x36xf32, #tpu.memory_space<vmem>>, vector<64x4xf32>
    tpu.vector_store %arg8[%c0_49, %c32_50], %70 {strides = array<i32>} : memref<64x36xf32, #tpu.memory_space<vmem>>, vector<64x4xf32>,
    %c0_51 = arith.constant 0 : index
    %c0_52 = arith.constant 0 : index
    %72 = vector.load %arg8[%c0_51, %c0_52] : memref<64x36xf32, #tpu.memory_space<vmem>>, vector<64x36xf32>
    %c1 = arith.constant 1 : index
    %c0_53 = arith.constant 0 : index
    %c0_54 = arith.constant 0 : index
    %73 = vector.load %arg5[%c1, %c0_53, %c0_54] : memref<3x36x4xf32, #tpu.memory_space<vmem>>, vector<1x36x4xf32>
    %74 = vector.shape_cast %73 : vector<1x36x4xf32> to vector<36x4xf32>
    %cst_55 = arith.constant dense<0.000000e+00> : vector<64x4xf32>
    %75 = tpu.matmul %72, %74, %cst_55 {dimension_numbers = #tpu.dot_dimension_numbers<[1], [0], [0], [1], [0, 0, 1, 1], [], []>} : vector<64x36xf32>, vector<36x4xf32>, vector<64x4xf32> -> vector<64x4xf32>
    %76 = arith.addf %44, %75 : vector<64x4xf32>
    %77 = vector.extract_strided_slice %11 {offsets = [0, 0, 0], sizes = [8, 8, 4], strides = [1, 1, 1]} : vector<10x10x4xf32> to vector<8x8x4xf32>
    %78 = vector.shape_cast %77 : vector<8x8x4xf32> to vector<64x4xf32>
    %c0_56 = arith.constant 0 : index
    %c0_57 = arith.constant 0 : index
    %79 = vector.load %arg8[%c0_56, %c0_57] : memref<64x36xf32, #tpu.memory_space<vmem>>, vector<64x4xf32>
    tpu.vector_store %arg8[%c0_56, %c0_57], %78 {strides = array<i32>} : memref<64x36xf32, #tpu.memory_space<vmem>>, vector<64x4xf32>,
    %80 = vector.extract_strided_slice %11 {offsets = [0, 1, 0], sizes = [8, 8, 4], strides = [1, 1, 1]} : vector<10x10x4xf32> to vector<8x8x4xf32>
    %81 = vector.shape_cast %80 : vector<8x8x4xf32> to vector<64x4xf32>
    %c0_58 = arith.constant 0 : index
    %c4_59 = arith.constant 4 : index
    %82 = vector.load %arg8[%c0_58, %c4_59] : memref<64x36xf32, #tpu.memory_space<vmem>>, vector<64x4xf32>
    tpu.vector_store %arg8[%c0_58, %c4_59], %81 {strides = array<i32>} : memref<64x36xf32, #tpu.memory_space<vmem>>, vector<64x4xf32>,
    %83 = vector.extract_strided_slice %11 {offsets = [0, 2, 0], sizes = [8, 8, 4], strides = [1, 1, 1]} : vector<10x10x4xf32> to vector<8x8x4xf32>
    %84 = vector.shape_cast %83 : vector<8x8x4xf32> to vector<64x4xf32>
    %c0_60 = arith.constant 0 : index
    %c8_61 = arith.constant 8 : index
    %85 = vector.load %arg8[%c0_60, %c8_61] : memref<64x36xf32, #tpu.memory_space<vmem>>, vector<64x4xf32>
    tpu.vector_store %arg8[%c0_60, %c8_61], %84 {strides = array<i32>} : memref<64x36xf32, #tpu.memory_space<vmem>>, vector<64x4xf32>,
    %86 = vector.extract_strided_slice %11 {offsets = [1, 0, 0], sizes = [8, 8, 4], strides = [1, 1, 1]} : vector<10x10x4xf32> to vector<8x8x4xf32>
    %87 = vector.shape_cast %86 : vector<8x8x4xf32> to vector<64x4xf32>
    %c0_62 = arith.constant 0 : index
    %c12_63 = arith.constant 12 : index
    %88 = vector.load %arg8[%c0_62, %c12_63] : memref<64x36xf32, #tpu.memory_space<vmem>>, vector<64x4xf32>
    tpu.vector_store %arg8[%c0_62, %c12_63], %87 {strides = array<i32>} : memref<64x36xf32, #tpu.memory_space<vmem>>, vector<64x4xf32>,
    %89 = vector.extract_strided_slice %11 {offsets = [1, 1, 0], sizes = [8, 8, 4], strides = [1, 1, 1]} : vector<10x10x4xf32> to vector<8x8x4xf32>
    %90 = vector.shape_cast %89 : vector<8x8x4xf32> to vector<64x4xf32>
    %c0_64 = arith.constant 0 : index
    %c16_65 = arith.constant 16 : index
    %91 = vector.load %arg8[%c0_64, %c16_65] : memref<64x36xf32, #tpu.memory_space<vmem>>, vector<64x4xf32>
    tpu.vector_store %arg8[%c0_64, %c16_65], %90 {strides = array<i32>} : memref<64x36xf32, #tpu.memory_space<vmem>>, vector<64x4xf32>,
    %92 = vector.extract_strided_slice %11 {offsets = [1, 2, 0], sizes = [8, 8, 4], strides = [1, 1, 1]} : vector<10x10x4xf32> to vector<8x8x4xf32>
    %93 = vector.shape_cast %92 : vector<8x8x4xf32> to vector<64x4xf32>
    %c0_66 = arith.constant 0 : index
    %c20_67 = arith.constant 20 : index
    %94 = vector.load %arg8[%c0_66, %c20_67] : memref<64x36xf32, #tpu.memory_space<vmem>>, vector<64x4xf32>
    tpu.vector_store %arg8[%c0_66, %c20_67], %93 {strides = array<i32>} : memref<64x36xf32, #tpu.memory_space<vmem>>, vector<64x4xf32>,
    %95 = vector.extract_strided_slice %11 {offsets = [2, 0, 0], sizes = [8, 8, 4], strides = [1, 1, 1]} : vector<10x10x4xf32> to vector<8x8x4xf32>
    %96 = vector.shape_cast %95 : vector<8x8x4xf32> to vector<64x4xf32>
    %c0_68 = arith.constant 0 : index
    %c24_69 = arith.constant 24 : index
    %97 = vector.load %arg8[%c0_68, %c24_69] : memref<64x36xf32, #tpu.memory_space<vmem>>, vector<64x4xf32>
    tpu.vector_store %arg8[%c0_68, %c24_69], %96 {strides = array<i32>} : memref<64x36xf32, #tpu.memory_space<vmem>>, vector<64x4xf32>,
    %98 = vector.extract_strided_slice %11 {offsets = [2, 1, 0], sizes = [8, 8, 4], strides = [1, 1, 1]} : vector<10x10x4xf32> to vector<8x8x4xf32>
    %99 = vector.shape_cast %98 : vector<8x8x4xf32> to vector<64x4xf32>
    %c0_70 = arith.constant 0 : index
    %c28_71 = arith.constant 28 : index
    %100 = vector.load %arg8[%c0_70, %c28_71] : memref<64x36xf32, #tpu.memory_space<vmem>>, vector<64x4xf32>
    tpu.vector_store %arg8[%c0_70, %c28_71], %99 {strides = array<i32>} : memref<64x36xf32, #tpu.memory_space<vmem>>, vector<64x4xf32>,
    %101 = vector.extract_strided_slice %11 {offsets = [2, 2, 0], sizes = [8, 8, 4], strides = [1, 1, 1]} : vector<10x10x4xf32> to vector<8x8x4xf32>
    %102 = vector.shape_cast %101 : vector<8x8x4xf32> to vector<64x4xf32>
    %c0_72 = arith.constant 0 : index
    %c32_73 = arith.constant 32 : index
    %103 = vector.load %arg8[%c0_72, %c32_73] : memref<64x36xf32, #tpu.memory_space<vmem>>, vector<64x4xf32>
    tpu.vector_store %arg8[%c0_72, %c32_73], %102 {strides = array<i32>} : memref<64x36xf32, #tpu.memory_space<vmem>>, vector<64x4xf32>,
    %c0_74 = arith.constant 0 : index
    %c0_75 = arith.constant 0 : index
    %104 = vector.load %arg8[%c0_74, %c0_75] : memref<64x36xf32, #tpu.memory_space<vmem>>, vector<64x36xf32>
    %c2 = arith.constant 2 : index
    %c0_76 = arith.constant 0 : index
    %c0_77 = arith.constant 0 : index
    %105 = vector.load %arg5[%c2, %c0_76, %c0_77] : memref<3x36x4xf32, #tpu.memory_space<vmem>>, vector<1x36x4xf32>
    %106 = vector.shape_cast %105 : vector<1x36x4xf32> to vector<36x4xf32>
    %cst_78 = arith.constant dense<0.000000e+00> : vector<64x4xf32>
    %107 = tpu.matmul %104, %106, %cst_78 {dimension_numbers = #tpu.dot_dimension_numbers<[1], [0], [0], [1], [0, 0, 1, 1], [], []>} : vector<64x36xf32>, vector<36x4xf32>, vector<64x4xf32> -> vector<64x4xf32>
    %108 = arith.addf %76, %107 : vector<64x4xf32>
    %cst_79 = arith.constant 0.000000e+00 : f32
    %109 = vector.broadcast %cst_79 : f32 to vector<64x4xf32>
    %110 = arith.maximumf %108, %109 : vector<64x4xf32>
    %c0_80 = arith.constant 0 : index
    %c0_81 = arith.constant 0 : index
    %111 = vector.load %arg6[%c0_80, %c0_81] : memref<4x4xf32, #tpu.memory_space<vmem>>, vector<4x4xf32>
    %cst_82 = arith.constant dense<0.000000e+00> : vector<64x4xf32>
    %112 = tpu.matmul %110, %111, %cst_82 {dimension_numbers = #tpu.dot_dimension_numbers<[1], [0], [0], [1], [0, 0, 1, 1], [], []>} : vector<64x4xf32>, vector<4x4xf32>, vector<64x4xf32> -> vector<64x4xf32>
    %113 = vector.extract_strided_slice %1 {offsets = [1, 1, 0], sizes = [8, 8, 4], strides = [1, 1, 1]} : vector<10x10x4xf32> to vector<8x8x4xf32>
    %114 = vector.shape_cast %113 : vector<8x8x4xf32> to vector<64x4xf32>
    %115 = arith.addf %114, %112 : vector<64x4xf32>
    %c0_83 = arith.constant 0 : index
    %c0_84 = arith.constant 0 : index
    %c0_85 = arith.constant 0 : index
    %c0_86 = arith.constant 0 : index
    %116 = vector.load %arg7[%c0_83, %c0_84, %c0_85, %c0_86] : memref<1x1x64x4xf32, #tpu.memory_space<vmem>>, vector<1x1x64x4xf32>
    %117 = vector.shape_cast %116 : vector<1x1x64x4xf32> to vector<64x4xf32>
    %118 = vector.shape_cast %115 : vector<64x4xf32> to vector<1x1x64x4xf32>
    tpu.vector_store %arg7[%c0_83, %c0_84, %c0_85, %c0_86], %118 {strides = array<i32>} : memref<1x1x64x4xf32, #tpu.memory_space<vmem>>, vector<1x1x64x4xf32>,
    return
  }
  func.func @transform_0(%arg0: i32, %arg1: i32) -> (i32, i32, i32, i32, i32) {
    %c0_i32 = arith.constant 0 : i32
    %0 = arith.addi %arg1, %c0_i32 : i32
    %c0_i32_0 = arith.constant 0 : i32
    %c0_i32_1 = arith.constant 0 : i32
    %c0_i32_2 = arith.constant 0 : i32
    %c0_i32_3 = arith.constant 0 : i32
    return %arg0, %0, %c0_i32_0, %c0_i32_1, %c0_i32_2 : i32, i32, i32, i32, i32
  }
  func.func @transform_1(%arg0: i32, %arg1: i32) -> (i32, i32, i32, i32, i32) {
    %c1_i32 = arith.constant 1 : i32
    %0 = arith.addi %arg1, %c1_i32 : i32
    %c0_i32 = arith.constant 0 : i32
    %c0_i32_0 = arith.constant 0 : i32
    %c0_i32_1 = arith.constant 0 : i32
    %c0_i32_2 = arith.constant 0 : i32
    return %arg0, %0, %c0_i32, %c0_i32_0, %c0_i32_1 : i32, i32, i32, i32, i32
  }
  func.func @transform_2(%arg0: i32, %arg1: i32) -> (i32, i32, i32, i32, i32) {
    %c2_i32 = arith.constant 2 : i32
    %0 = arith.addi %arg1, %c2_i32 : i32
    %c0_i32 = arith.constant 0 : i32
    %c0_i32_0 = arith.constant 0 : i32
    %c0_i32_1 = arith.constant 0 : i32
    %c0_i32_2 = arith.constant 0 : i32
    return %arg0, %0, %c0_i32, %c0_i32_0, %c0_i32_1 : i32, i32, i32, i32, i32
  }
  func.func @transform_3(%arg0: i32, %arg1: i32) -> (i32, i32, i32) {
    %c0_i32 = arith.constant 0 : i32
    %c0_i32_0 = arith.constant 0 : i32
    %c0_i32_1 = arith.constant 0 : i32
    %c0_i32_2 = arith.constant 0 : i32
    return %c0_i32, %c0_i32_0, %c0_i32_1 : i32, i32, i32
  }
  func.func @transform_4(%arg0: i32, %arg1: i32) -> (i32, i32) {
    %c0_i32 = arith.constant 0 : i32
    %c0_i32_0 = arith.constant 0 : i32
    %c0_i32_1 = arith.constant 0 : i32
    return %c0_i32, %c0_i32_0 : i32, i32
  }
  func.func @transform_5(%arg0: i32, %arg1: i32) -> (i32, i32, i32, i32) {
    %c0_i32 = arith.constant 0 : i32
    %c0_i32_0 = arith.constant 0 : i32
    %c0_i32_1 = arith.constant 0 : i32
    return %arg0, %arg1, %c0_i32, %c0_i32_0 : i32, i32, i32, i32
  }
}

</mosaic_0001>

<bundles_post_ra>
// kernel: residual_layer_pallas.1
= control target key start
LH: loop header
LB: loop body
LE: loop exit
PB: predicated region body
PF: predicated region fallthrough
CT: control target
= control target key end

     0   :  { %s2240_s18 = smov 0   ;;  %s2242_s19 = smov 0   ;;  %s3358_s0 = inlined_call_operand.vmem [shape: f32[2,10,10,10,4], index: 0, kind: input, shape index: {}, may-alias: {0,1,2}]   ;;  %s3359_s1 = inlined_call_operand.vmem [shape: f32[2,10,10,10,4], index: 1, kind: input, shape index: {}, may-alias: {0,1,2}]   ;;  %s3360_s2 = inlined_call_operand.vmem [shape: f32[2,10,10,10,4], index: 2, kind: input, shape index: {}, may-alias: {0,1,2}]   ;;  %s3361_s3 = inlined_call_operand.vmem [shape: f32[3,36,4], index: 3, kind: input, shape index: {}]   ;;  %s3362_s4 = inlined_call_operand.vmem [shape: f32[4,4], index: 4, kind: input, shape index: {}]   ;;  %s3363_s5 = inlined_call_operand.vmem [shape: f32[2,8,64,4], index: 5, kind: output, shape index: {}]  }
   0x1   :  { %s2244_s20 = smov 0   ;;  %s2246_s21 = smov 0  }
   0x2   :  { %s2248_s22 = smov 0  }
   0x3 LB: > { %s24_s23 = sadd.s32 1, %s2192_s20  ;;  %s27_s24 = sadd.s32 1, %s2196_s21  ;;  %s2200_s22 = sphi %s2248_s22, %s15_s22   ;;  %s2196_s21 = sphi %s2246_s21, %s3367_s21   ;;  %s2192_s20 = sphi %s2244_s20, %s3366_s20   ;;  %s2188_s19 = sphi %s2242_s19, %s3365_s19   ;;  %s2184_s18 = sphi %s2240_s18, %s3364_s18  }
   0x4   : > { %p25_p0 = scmp.ge.s32.totalorder %s24_s23, 8  ;;  %p2043_p1 = scmp.ge.s32.totalorder %s2200_s22, 1 }
   0x5   : > { %p247_p2 = scmp.lt.s32.totalorder %s2200_s22, 17 }
   0x6   : > { %s3369_s23 = smov (%p25_p0, %s24_s23), 0  ;;  %s3371_s24 = smov (!%p25_p0, %s27_s24), %s2196_s21 }
   0x7   : > { %p248_p3 = pnand %p2043_p1, %p247_p2  ;;  %p29_p4 = scmp.ge.s32.totalorder %s3371_s24, 2 }
   0x8   : > { %p303_p5 = scmp.lt.s32.totalorder (!%p248_p3), %s2188_s19, 1  ;;  %p305_p6 = scmp.lt.s32.totalorder (!%p248_p3), %s2184_s18, 9 }
   0x9   : > { %s3373_s24 = smov (%p29_p4, %s3371_s24), 0  ;;  %251 = sbr.rel (%p248_p3) target bundleno = 929 (0x3a1), region = 40 }
   0xa   : > { %s2202_s8 = smov (!%p248_p3), 4   ;;  %s2203_s9 = smov (!%p248_p3), 8  }
   0xb   : > { %s2204_s10 = smov (!%p248_p3), 12   ;;  %s2205_s11 = smov (!%p248_p3), 16  }
   0xc   : > { %s2206_s12 = smov (!%p248_p3), 20   ;;  %s2207_s13 = smov (!%p248_p3), 24  }
   0xd   : > { %s312_s14 = sadd.s32 (!%p248_p3), 1, %s2184_s18  ;;  %s2208_s15 = smov (!%p248_p3), 28  }
   0xe   : > { %s3375_s19 = smov (!%p303_p5, %s2188_s19), 1  ;;  %vm488_vm0 = vcmask 1046528   ;;  %vm546_vm1 = vcmask 1045504   ;;  %vm463_vm2 = vcmask 31744   ;;  %vm537_vm3 = vcmask 64544   ;;  %p315_p7 = scmp.lt.s32.totalorder %s312_s14, 9 }
   0xf   : > { %s306_s25 = scalar_select %p305_p6, %s2184_s18, 9  ;;  %vm595_vm4 = vcmask 97344   ;;  %vm629_vm5 = vcmask 130144   ;;  %vm666_vm6 = vcmask 162944   ;;  %vm702_vm7 = vcmask 195744  }
  0x10   : > { %s2277_s26 = smul.u32 200, %s3375_s19  ;;  %s3377_s14 = smov (!%p315_p7, %s312_s14), 9  ;;  %vm736_vm8 = vcmask 228544   ;;  %vm1214_vm9 = vcmask 1043456   ;;  %vm773_vm10 = vcmask 261344   ;;  %vm809_vm11 = vcmask 294144  }
  0x11   : > { %s2098_s27 = smul.u32 20, %s306_s25  ;;  %s2209_s30 = smov 32   ;;  %vm1189_vm12 = vcmask 293888  }
  0x12   : > { %s2100_s16 = smul.u32 20, %s3377_s14  ;;  %s323_s6 = sadd.s32 2, %s2184_s18 }
  0x13   : > { %s309_s28 = sadd.s32 %s2277_s26, %s2098_s27  ;;  %p326_p8 = scmp.lt.s32.totalorder %s323_s6, 9 }
  0x14   : > { %s2044_s29 = sshll.u32 %s309_s28, 3  ;;  %s319_s17 = sadd.s32 %s2100_s16, %s2277_s26 }
  0x15   : > { %s2283_s7 = scalar_lea.vmem %s3358_s0, %s2044_s29  ;;  %s2045_s25 = sshll.u32 %s319_s17, 3 }
  0x16   : > { %v367_v0 = vld [vmem:[%s2283_s7 + $0x20] sm:$0xff]  ;;  %v2287_v1 = vld [vmem:[%s2283_s7 + $0x28] sm:$0x3]  ;;  %v369_v7 = vld [vmem:[%s2283_s7 + $0x30] sm:$0xff]  ;;  %s2548_s29 = scalar_lea.vmem %s3359_s1, %s2045_s25  ;;  %s3379_s6 = smov (!%p326_p8, %s323_s6), 9 }
  0x17   : > { %v363_v2 = vld [vmem:[%s2283_s7] sm:$0xff]  ;;  %v2290_v3 = vmax.f32 %v367_v0, 0.0  ;;  %v388_v4 = vmax.f32 %v2287_v1, 0.0  ;;  %v364_v5 = vld [vmem:[%s2283_s7 + $0x8] sm:$0x3]  ;;  %v2300_v10 = vmax.f32 %v369_v7, 0.0 }
  0x18   : > { %v2294_v6 = vmax.f32 %v363_v2, 0.0  ;;  %v384_v8 = vmax.f32 %v364_v5, 0.0  ;;  %v2298_v9 = vld [vmem:[%s2283_s7 + $0x38] sm:$0x3]  ;;  %v365_v11 = vld [vmem:[%s2283_s7 + $0x10] sm:$0xff]  ;;  %v371_v22 = vld [vmem:[%s2283_s7 + $0x40] sm:$0xff] }
  0x19   : > { %v495_v12 = vrot.slane %v2290_v3, 1  ;;  %v496_v13 = vrot.slane %v388_v4, 1  ;;  %v390_v15 = vmax.f32 %v2298_v9, 0.0  ;;  %v366_v16 = vld [vmem:[%s2283_s7 + $0x18] sm:$0x3]  ;;  %v2309_v18 = vmax.f32 %v365_v11, 0.0 }
  0x1a   : > { %v489_v14 = vrot.slane %v2294_v6, 1  ;;  %v490_v17 = vrot.slane %v384_v8, 1  ;;  %v386_v19 = vmax.f32 %v366_v16, 0.0  ;;  %v372_v23 = vld [vmem:[%s2283_s7 + $0x48] sm:$0x3]  ;;  %v498_v24 = vrot.slane %v2300_v10, 1 }
  0x1b   : > { %v2312_v20 = vsel %vm488_vm0, %v495_v12, %v496_v13  ;;  %v499_v25 = vrot.slane %v390_v15, 1  ;;  %v492_v26 = vrot.slane %v2309_v18, 1  ;;  %v377_v27 = vld [vmem:[%s2283_s7 + $0x70] sm:$0xff]  ;;  %v2326_v28 = vld [vmem:[%s2283_s7 + $0x78] sm:$0x3]  ;;  %v2328_v30 = vmax.f32 %v371_v22, 0.0 }
  0x1c   : > { %517 = vrot.lane.b32.xlu1 %v2312_v20, %s2202_s8  ;;  %v491_v21 = vsel %vm488_vm0, %v489_v14, %v490_v17  ;;  %v493_v29 = vrot.slane %v386_v19, 1  ;;  %v392_v31 = vmax.f32 %v372_v23, 0.0  ;;  %v373_v32 = vld [vmem:[%s2283_s7 + $0x50] sm:$0xff]  ;;  %v374_v33 = vld [vmem:[%s2283_s7 + $0x58] sm:$0x3]  ;;  %v375_v34 = vld [vmem:[%s2283_s7 + $0x60] sm:$0xff] }
  0x1d   : > { %513 = vrot.lane.b32.xlu0 %v491_v21, %s2202_s8  ;;  %v376_v35 = vld [vmem:[%s2283_s7 + $0x68] sm:$0x3]  ;;  %v2334_v36 = vmax.f32 %v377_v27, 0.0  ;;  %v501_v37 = vrot.slane %v2328_v30, 1  ;;  %v2338_v39 = vsel %vm488_vm0, %v498_v24, %v499_v25  ;;  %v398_v40 = vmax.f32 %v2326_v28, 0.0  ;;  %v379_v21 = vld [vmem:[%s2283_s7 + $0x80] sm:$0xff] }
  0x1e   : > { %v502_v38 = vrot.slane %v392_v31, 1  ;;  %v2341_v41 = vmax.f32 %v373_v32, 0.0  ;;  %v394_v42 = vmax.f32 %v374_v33, 0.0  ;;  %v2344_v43 = vsel %vm488_vm0, %v492_v26, %v493_v29  ;;  %v380_v23 = vld [vmem:[%s2283_s7 + $0x88] sm:$0x3]  ;;  %468 = vst.msk [vmem:[#allocation2 + $0x20] sm:$0xff] %vm463_vm2, %v2328_v30 }
  0x1f   : > { %v2346_v44 = vmax.f32 %v375_v34, 0.0  ;;  %v396_v45 = vmax.f32 %v376_v35, 0.0  ;;  %v510_v49 = vrot.slane %v2334_v36, 1  ;;  %v511_v50 = vrot.slane %v398_v40, 1  ;;  %464 = vst.msk [vmem:[#allocation2] sm:$0xff] %vm463_vm2, %v2294_v6  ;;  %p336_p9 = scmp.lt.s32.totalorder %s2184_s18, 7 }
  0x20   : > { %v2349_v46 = vsel %vm488_vm0, %v501_v37, %v502_v38  ;;  %v504_v47 = vrot.slane %v2341_v41, 1  ;;  %v505_v48 = vrot.slane %v394_v42, 1  ;;  %v547_v56 = vrot.slane %v2294_v6, 2  ;;  %465 = vst.msk [vmem:[#allocation2 + $0x8] sm:$0xff] %vm463_vm2, %v2309_v18 }
  0x21   : > { %521 = vrot.lane.b32.xlu2 %v2349_v46, %s2202_s8  ;;  %v507_v51 = vrot.slane %v2346_v44, 1  ;;  %v508_v52 = vrot.slane %v396_v45, 1  ;;  %v2364_v54 = vsel %vm488_vm0, %v510_v49, %v511_v50  ;;  %v548_v57 = vrot.slane %v384_v8, 2  ;;  %466 = vst.msk [vmem:[#allocation2 + $0x10] sm:$0xff] %vm463_vm2, %v2290_v3  ;;  %v343_v49 = vld [vmem:[%s2548_s29] sm:$0xff]  ;;  %s3381_s18 = smov (!%p336_p9, %s2184_s18), 7 }
  0x22   : > { %v2361_v53 = vsel %vm488_vm0, %v504_v47, %v505_v48  ;;  %v553_v58 = vrot.slane %v2290_v3, 2  ;;  %v554_v59 = vrot.slane %v388_v4, 2  ;;  %v550_v60 = vrot.slane %v2309_v18, 2  ;;  %467 = vst.msk [vmem:[#allocation2 + $0x18] sm:$0xff] %vm463_vm2, %v2300_v10  ;;  %v344_v50 = vld [vmem:[%s2548_s29 + $0x8] sm:$0x3] }
  0x23   : > { %v2367_v55 = vsel %vm488_vm0, %v507_v51, %v508_v52  ;;  %v551_v61 = vrot.slane %v386_v19, 2  ;;  %v549_v62 = vsel %vm546_vm1, %v547_v56, %v548_v57  ;;  %v556_v1 = vrot.slane %v2300_v10, 2  ;;  %469 = vst.msk [vmem:[#allocation2 + $0x28] sm:$0xff] %vm463_vm2, %v2341_v41 }
  0x24   : > { %519 = vrot.lane.b32.xlu1 %v2338_v39, %s2202_s8  ;;  %v2382_v63 = vsel %vm546_vm1, %v553_v58, %v554_v59  ;;  %v557_v2 = vrot.slane %v390_v15, 2  ;;  %v562_v4 = vrot.slane %v2341_v41, 2  ;;  %v563_v5 = vrot.slane %v394_v42, 2  ;;  %470 = vst.msk [vmem:[#allocation2 + $0x30] sm:$0xff] %vm463_vm2, %v2346_v44 }
  0x25   : > { %515 = vrot.lane.b32.xlu0 %v2344_v43, %s2202_s8  ;;  %v552_v0 = vsel %vm546_vm1, %v550_v60, %v551_v61  ;;  %v559_v7 = vrot.slane %v2328_v30, 2  ;;  %v560_v8 = vrot.slane %v392_v31, 2  ;;  %v565_v9 = vrot.slane %v2346_v44, 2  ;;  %471 = vst.msk [vmem:[#allocation2 + $0x38] sm:$0xff] %vm463_vm2, %v2334_v36  ;;  %v345_v60 = vld [vmem:[%s2548_s29 + $0x10] sm:$0xff] }
  0x26   : > { %v2395_v11 = vsel %vm546_vm1, %v556_v1, %v557_v2  ;;  %v2398_v12 = vsel %vm546_vm1, %v562_v4, %v563_v5  ;;  %v566_v14 = vrot.slane %v396_v45, 2  ;;  %v568_v15 = vrot.slane %v2334_v36, 2  ;;  %v346_v61 = vld [vmem:[%s2548_s29 + $0x18] sm:$0x3] }
  0x27   : > { %v2401_v13 = vsel %vm546_vm1, %v559_v7, %v560_v8  ;;  %v569_v16 = vrot.slane %v398_v40, 2  ;;  %v399_v22 = vmax.f32 %v379_v21, 0.0  ;;  %v400_v24 = vmax.f32 %v380_v23, 0.0  ;;  %v2523_v40 = vld [vmem:[%s2283_s7 + $0x98] sm:$0x3] }
  0x28   : > { %v2412_v17 = vsel %vm546_vm1, %v565_v9, %v566_v14  ;;  %v402_v42 = vmax.f32 %v2523_v40, 0.0  ;;  %v2558_v52 = vmax.f32 %v343_v49, 0.0  ;;  %v406_v1 = vmax.f32 %v346_v61, 0.0  ;;  %v347_v9 = vld [vmem:[%s2548_s29 + $0x20] sm:$0xff]  ;;  %v348_v14 = vld [vmem:[%s2548_s29 + $0x28] sm:$0x3] }
  0x29   : > { %523 = vrot.lane.b32.xlu2 %v2361_v53, %s2202_s8  ;;  %v2415_v19 = vsel %vm546_vm1, %v568_v15, %v569_v16  ;;  %v639_v25 = vrot.slane %v399_v22, 1  ;;  %v640_v26 = vrot.slane %v400_v24, 1  ;;  %v676_v28 = vrot.slane %v400_v24, 2 }
  0x2a   : > { %v855_v58 = vrot.slane %v2558_v52, 1  ;;  %v915_v5 = vrot.slane %v406_v1, 2  ;;  %v2589_v16 = vmax.f32 %v347_v9, 0.0  ;;  %v408_v21 = vmax.f32 %v348_v14, 0.0 }
  0x2b   : > { %v2455_v27 = vsel %vm488_vm0, %v639_v25, %v640_v26 }
  0x2c   : > { %527 = vrot.lane.b32.xlu1 %v2364_v54, %s2202_s8  ;;  %v917_v23 = vrot.slane %v2589_v16, 2  ;;  %v918_v24 = vrot.slane %v408_v21, 2 }
  0x2d   : > { %525 = vrot.lane.b32.xlu0 %v2367_v55, %s2202_s8 }
  0x31   : > { %571 = vrot.lane.b32.xlu2 %v549_v62, %s2203_s9 }
  0x34   : > { %575 = vrot.lane.b32.xlu1 %v2382_v63, %s2203_s9 }
  0x35   : > { %573 = vrot.lane.b32.xlu0 %v552_v0, %s2203_s9 }
  0x39   : > { %577 = vrot.lane.b32.xlu2 %v2395_v11, %s2203_s9 }
  0x3c   : > { %581 = vrot.lane.b32.xlu1 %v2398_v12, %s2203_s9 }
  0x3d   : > { %579 = vrot.lane.b32.xlu0 %v2401_v13, %s2203_s9 }
  0x41   : > { %583 = vrot.lane.b32.xlu2 %v2412_v17, %s2203_s9 }
  0x44   : > { %605 = vrot.lane.b32.xlu1 %v2309_v18, %s2204_s10  ;;  %v675_v18 = vrot.slane %v399_v22, 2 }
  0x45   : > { %585 = vrot.lane.b32.xlu0 %v2415_v19, %s2203_s9 }
  0x46   : > { %v2486_v29 = vsel %vm546_vm1, %v675_v18, %v676_v28  ;;  %v2602_v28 = vsel %vm546_vm1, %v917_v23, %v918_v24  ;;  %v352_v23 = vld [vmem:[%s2548_s29 + $0x48] sm:$0x3] }
  0x49   : > { %607 = vrot.lane.b32.xlu2 %v2290_v3, %s2204_s10 }
  0x4c   : > { %611 = vrot.lane.b32.xlu1 %v2328_v30, %s2204_s10 }
  0x4d   : > { %609 = vrot.lane.b32.xlu0 %v2300_v10, %s2204_s10 }
  0x51   : > { %613 = vrot.lane.b32.xlu2 %v2341_v41, %s2204_s10 }
  0x54   : > { %617 = vrot.lane.b32.xlu1 %v2334_v36, %s2204_s10 }
  0x55   : > { %615 = vrot.lane.b32.xlu0 %v2346_v44, %s2204_s10 }
  0x59   : > { %619 = vrot.lane.b32.xlu2 %v399_v22, %s2204_s10 }
  0x5c   : > { %644 = vrot.lane.b32.xlu1 %v2312_v20, %s2205_s11 }
  0x5d   : > { %642 = vrot.lane.b32.xlu0 %v2344_v43, %s2205_s11 }
  0x61   : > { %646 = vrot.lane.b32.xlu2 %v2338_v39, %s2205_s11 }
  0x64   : > { %650 = vrot.lane.b32.xlu1 %v2361_v53, %s2205_s11 }
  0x65   : > { %648 = vrot.lane.b32.xlu0 %v2349_v46, %s2205_s11 }
  0x69   : > { %652 = vrot.lane.b32.xlu2 %v2367_v55, %s2205_s11 }
  0x6c   : > { %656 = vrot.lane.b32.xlu1 %v2455_v27, %s2205_s11 }
  0x6d   : > { %654 = vrot.lane.b32.xlu0 %v2364_v54, %s2205_s11 }
  0x71   : > { %678 = vrot.lane.b32.xlu2 %v552_v0, %s2206_s12  ;;  %v2574_v0 = vmax.f32 %v345_v60, 0.0 }
  0x73   : > { %v914_v4 = vrot.slane %v2574_v0, 2 }
  0x74   : > { %682 = vrot.lane.b32.xlu1 %v2395_v11, %s2206_s12 }
  0x75   : > { %680 = vrot.lane.b32.xlu0 %v2382_v63, %s2206_s12 }
  0x79   : > { %684 = vrot.lane.b32.xlu2 %v2401_v13, %s2206_s12 }
  0x7b   : > { %v522_v6 = vpop.permute.xlu2 %521 }
  0x7c   : > { %688 = vrot.lane.b32.xlu1 %v2412_v17, %s2206_s12  ;;  %542 = vst.msk [vmem:[#allocation2 + $0x20] sm:$0xff] %vm537_vm3, %v522_v6  ;;  %v862_v6 = vrot.slane %v408_v21, 1  ;;  %v351_v21 = vld [vmem:[%s2548_s29 + $0x40] sm:$0xff] }
  0x7d   : > { %686 = vrot.lane.b32.xlu0 %v2398_v12, %s2206_s12 }
  0x81   : > { %690 = vrot.lane.b32.xlu2 %v2415_v19, %s2206_s12 }
  0x83   : > { %v524_v31 = vpop.permute.xlu2 %523 }
  0x84   : > { %712 = vrot.lane.b32.xlu1 %v2290_v3, %s2207_s13  ;;  %543 = vst.msk [vmem:[#allocation2 + $0x28] sm:$0xff] %vm537_vm3, %v524_v31 }
  0x85   : > { %692 = vrot.lane.b32.xlu0 %v2486_v29, %s2206_s12 }
  0x89   : > { %714 = vrot.lane.b32.xlu2 %v2300_v10, %s2207_s13  ;;  %v381_v10 = vld [vmem:[%s2283_s7 + $0x90] sm:$0xff]  ;;  %s2101_s7 = smul.u32 20, %s3379_s6 }
  0x8a   : > { %v2512_v37 = vmax.f32 %v381_v10, 0.0  ;;  %v349_v10 = vld [vmem:[%s2548_s29 + $0x30] sm:$0xff] }
  0x8b   : > { %v572_v32 = vpop.permute.xlu2 %571  ;;  %s330_s14 = sadd.s32 %s2101_s7, %s2277_s26 }
  0x8c   : > { %718 = vrot.lane.b32.xlu1 %v2341_v41, %s2207_s13  ;;  %s2046_s16 = sshll.u32 %s330_s14, 3 }
  0x8d   : > { %716 = vrot.lane.b32.xlu0 %v2328_v30, %s2207_s13  ;;  %s2630_s27 = scalar_lea.vmem %s3360_s2, %s2046_s16 }
  0x8e   : > { %v518_v33 = vpop.permute.xlu1 %517 }
  0x8f   : > { %540 = vst.msk [vmem:[#allocation2 + $0x10] sm:$0xff] %vm537_vm3, %v518_v33  ;;  %v514_v3 = vpop.permute.xlu0 %513 }
  0x90   : > { %538 = vst.msk [vmem:[#allocation2] sm:$0xff] %vm537_vm3, %v514_v3 }
  0x91   : > { %596 = vst.msk [vmem:[#allocation2] sm:$0xff] %vm595_vm4, %v572_v32  ;;  %720 = vrot.lane.b32.xlu2 %v2346_v44, %s2207_s13 }
  0x93   : > { %v578_v30 = vpop.permute.xlu2 %577 }
  0x94   : > { %724 = vrot.lane.b32.xlu1 %v399_v22, %s2207_s13 }
  0x95   : > { %722 = vrot.lane.b32.xlu0 %v2334_v36, %s2207_s13 }
  0x96   : > { %v520_v34 = vpop.permute.xlu1 %519 }
  0x97   : > { %541 = vst.msk [vmem:[#allocation2 + $0x18] sm:$0xff] %vm537_vm3, %v520_v34  ;;  %v516_v35 = vpop.permute.xlu0 %515 }
  0x98   : > { %539 = vst.msk [vmem:[#allocation2 + $0x8] sm:$0xff] %vm537_vm3, %v516_v35 }
  0x99   : > { %599 = vst.msk [vmem:[#allocation2 + $0x18] sm:$0xff] %vm595_vm4, %v578_v30  ;;  %726 = vrot.lane.b32.xlu2 %v2512_v37, %s2207_s13 }
  0x9b   : > { %v584_v36 = vpop.permute.xlu2 %583 }
  0x9c   : > { %751 = vrot.lane.b32.xlu1 %v2338_v39, %s2208_s15  ;;  %v747_v39 = vrot.slane %v402_v42, 1 }
  0x9d   : > { %749 = vrot.lane.b32.xlu0 %v2312_v20, %s2208_s15  ;;  %v746_v20 = vrot.slane %v2512_v37, 1 }
  0x9e   : > { %v528_v38 = vpop.permute.xlu1 %527 }
  0x9f   : > { %545 = vst.msk [vmem:[#allocation2 + $0x38] sm:$0xff] %vm537_vm3, %v528_v38  ;;  %v526_v41 = vpop.permute.xlu0 %525  ;;  %v2623_v38 = vmax.f32 %v349_v10, 0.0  ;;  %v427_v10 = vld [vmem:[%s2630_s27 + $0x20] sm:$0xff] }
  0xa0   : > { %544 = vst.msk [vmem:[#allocation2 + $0x30] sm:$0xff] %vm537_vm3, %v526_v41 }
  0xa1   : > { %602 = vst.msk [vmem:[#allocation2 + $0x30] sm:$0xff] %vm595_vm4, %v584_v36  ;;  %753 = vrot.lane.b32.xlu2 %v2349_v46, %s2208_s15  ;;  %v748_v46 = vsel %vm488_vm0, %v746_v20, %v747_v39  ;;  %v350_v36 = vld [vmem:[%s2548_s29 + $0x38] sm:$0x3]  ;;  %v864_v20 = vrot.slane %v2623_v38, 1 }
  0xa2   : > { %v410_v41 = vmax.f32 %v350_v36, 0.0  ;;  %v828_v36 = vld [vmem:[%s3361_s3 + $0x10] sm:$0xff] }
  0xa3   : > { %v608_v43 = vpop.permute.xlu2 %607 }
  0xa4   : > { %757 = vrot.lane.b32.xlu1 %v2367_v55, %s2208_s15  ;;  %v865_v39 = vrot.slane %v410_v41, 1 }
  0xa5   : > { %755 = vrot.lane.b32.xlu0 %v2361_v53, %s2208_s15  ;;  %v404_v53 = vmax.f32 %v344_v50, 0.0 }
  0xa6   : > { %v576_v44 = vpop.permute.xlu1 %575  ;;  %v2643_v50 = vsel %vm488_vm0, %v864_v20, %v865_v39  ;;  %v2716_v20 = vmax.f32 %v427_v10, 0.0  ;;  %v827_v39 = vld [vmem:[%s3361_s3 + $0x8] sm:$0xff] }
  0xa7   : > { %598 = vst.msk [vmem:[#allocation2 + $0x10] sm:$0xff] %vm595_vm4, %v576_v44  ;;  %v574_v45 = vpop.permute.xlu0 %573  ;;  %v912_v55 = vrot.slane %v404_v53, 2  ;;  %v856_v59 = vrot.slane %v404_v53, 1 }
  0xa8   : > { %597 = vst.msk [vmem:[#allocation2 + $0x8] sm:$0xff] %vm595_vm4, %v574_v45  ;;  %v920_v45 = vrot.slane %v2623_v38, 2 }
  0xa9   : > { %631 = vst.msk [vmem:[#allocation2 + $0x8] sm:$0xff] %vm629_vm5, %v608_v43  ;;  %759 = vrot.lane.b32.xlu2 %v2364_v54, %s2208_s15  ;;  %v911_v54 = vrot.slane %v2558_v52, 2  ;;  %v857_v2 = vsel %vm488_vm0, %v855_v58, %v856_v59 }
  0xab   : > { %v614_v47 = vpop.permute.xlu2 %613 }
  0xac   : > { %763 = vrot.lane.b32.xlu1 %v748_v46, %s2208_s15  ;;  %v921_v46 = vrot.slane %v410_v41, 2 }
  0xad   : > { %761 = vrot.lane.b32.xlu0 %v2455_v27, %s2208_s15  ;;  %v861_v27 = vrot.slane %v2589_v16, 1 }
  0xae   : > { %v582_v48 = vpop.permute.xlu1 %581 }
  0xaf   : > { %601 = vst.msk [vmem:[#allocation2 + $0x28] sm:$0xff] %vm595_vm4, %v582_v48  ;;  %v580_v51 = vpop.permute.xlu0 %579  ;;  %v863_v31 = vsel %vm488_vm0, %v861_v27, %v862_v6  ;;  %v424_v48 = vld [vmem:[%s2630_s27 + $0x8] sm:$0x3]  ;;  %v412_v6 = vmax.f32 %v352_v23, 0.0 }
  0xb0   : > { %600 = vst.msk [vmem:[#allocation2 + $0x20] sm:$0xff] %vm595_vm4, %v580_v51  ;;  %v444_v53 = vmax.f32 %v424_v48, 0.0  ;;  %v826_v48 = vld [vmem:[%s3361_s3] sm:$0xff]  ;;  %v2050_v23 = vld [vmem:[%s3361_s3 + $0x28] sm:$0xff] }
  0xb1   : > { %634 = vst.msk [vmem:[#allocation2 + $0x20] sm:$0xff] %vm629_vm5, %v614_v47  ;;  %785 = vrot.lane.b32.xlu2 %v2382_v63, %s2209_s30  ;;  %v913_v63 = vsel %vm546_vm1, %v911_v54, %v912_v55  ;;  %v423_v47 = vld [vmem:[%s2630_s27] sm:$0xff]  ;;  %v2649_v54 = vsel %vm546_vm1, %v920_v45, %v921_v46  ;;  %v924_v46 = vrot.slane %v412_v6, 2 }
  0xb2   : > { %v2646_v51 = vmax.f32 %v423_v47, 0.0  ;;  %v1408_v58 = vrot.slane %v444_v53, 2 }
  0xb3   : > { %v620_v56 = vpop.permute.xlu2 %619 }
  0xb4   : > { %789 = vrot.lane.b32.xlu1 %v2401_v13, %s2209_s30  ;;  %v859_v13 = vrot.slane %v406_v1, 1  ;;  %v1351_v55 = vrot.slane %v2646_v51, 1 }
  0xb5   : > { %787 = vrot.lane.b32.xlu0 %v2395_v11, %s2209_s30  ;;  %v858_v11 = vrot.slane %v2574_v0, 1 }
  0xb6   : > { %v606_v57 = vpop.permute.xlu1 %605 }
  0xb7   : > { %630 = vst.msk [vmem:[#allocation2] sm:$0xff] %vm629_vm5, %v606_v57  ;;  %v586_v62 = vpop.permute.xlu0 %585  ;;  %v860_v22 = vsel %vm488_vm0, %v858_v11, %v859_v13  ;;  %v1407_v57 = vrot.slane %v2646_v51, 2 }
  0xb8   : > { %603 = vst.msk [vmem:[#allocation2 + $0x38] sm:$0xff] %vm595_vm4, %v586_v62 }
  0xb9   : > { %637 = vst.msk [vmem:[#allocation2 + $0x38] sm:$0xff] %vm629_vm5, %v620_v56  ;;  %791 = vrot.lane.b32.xlu2 %v2398_v12, %s2209_s30  ;;  %v916_v12 = vsel %vm546_vm1, %v914_v4, %v915_v5  ;;  %v1352_v56 = vrot.slane %v444_v53, 1  ;;  %v425_v4 = vld [vmem:[%s2630_s27 + $0x10] sm:$0xff]  ;;  %v426_v5 = vld [vmem:[%s2630_s27 + $0x18] sm:$0x3] }
  0xba   : > { %v446_v11 = vmax.f32 %v426_v5, 0.0 }
  0xbb   : > { %v647_v7 = vpop.permute.xlu2 %646  ;;  %v1353_v62 = vsel %vm488_vm0, %v1351_v55, %v1352_v56 }
  0xbc   : > { %935 = vrot.lane.b32.xlu1 %v913_v63, %s2203_s9  ;;  %v1409_v63 = vsel %vm546_vm1, %v1407_v57, %v1408_v58  ;;  %v1355_v9 = vrot.slane %v446_v11, 1  ;;  %v1413_v57 = vrot.slane %v2716_v20, 2 }
  0xbd   : > { %879 = vrot.lane.b32.xlu0 %v857_v2, %s2202_s8 }
  0xbe   : > { %v612_v8 = vpop.permute.xlu1 %611 }
  0xbf   : > { %633 = vst.msk [vmem:[#allocation2 + $0x18] sm:$0xff] %vm629_vm5, %v612_v8  ;;  %v610_v15 = vpop.permute.xlu0 %609  ;;  %v2671_v8 = vmax.f32 %v425_v4, 0.0 }
  0xc0   : > { %632 = vst.msk [vmem:[#allocation2 + $0x10] sm:$0xff] %vm629_vm5, %v610_v15  ;;  %v1411_v15 = vrot.slane %v446_v11, 2  ;;  %v2052_v11 = vld [vmem:[%s3361_s3 + $0x38] sm:$0xff] }
  0xc1   : > { %669 = vst.msk [vmem:[#allocation2 + $0x10] sm:$0xff] %vm666_vm6, %v647_v7  ;;  %968 = vrot.lane.b32.xlu2 %v2574_v0, %s2204_s10  ;;  %v1354_v13 = vrot.slane %v2671_v8, 1  ;;  %v1410_v14 = vrot.slane %v2671_v8, 2 }
  0xc3   : > { %v653_v25 = vpop.permute.xlu2 %652  ;;  %v2690_v27 = vsel %vm546_vm1, %v1410_v14, %v1411_v15  ;;  %v429_v15 = vld [vmem:[%s2630_s27 + $0x30] sm:$0xff] }
  0xc4   : > { %1039 = vrot.lane.b32.xlu1 %v916_v12, %s2206_s12 }
  0xc5   : > { %1004 = vrot.lane.b32.xlu0 %v860_v22, %s2205_s11 }
  0xc6   : > { %v618_v26 = vpop.permute.xlu1 %617 }
  0xc7   : > { %636 = vst.msk [vmem:[#allocation2 + $0x30] sm:$0xff] %vm629_vm5, %v618_v26  ;;  %v616_v18 = vpop.permute.xlu0 %615  ;;  %v1356_v26 = vsel %vm488_vm0, %v1354_v13, %v1355_v9  ;;  %v2051_v9 = vld [vmem:[%s3361_s3 + $0x30] sm:$0xff] }
  0xc8   : > { %635 = vst.msk [vmem:[#allocation2 + $0x28] sm:$0xff] %vm629_vm5, %v616_v18 }
  0xc9   : > { %672 = vst.msk [vmem:[#allocation2 + $0x28] sm:$0xff] %vm666_vm6, %v653_v25  ;;  %1072 = vrot.lane.b32.xlu2 %v2589_v16, %s2207_s13  ;;  %v2686_v25 = vmax.f32 %v351_v21, 0.0 }
  0xcb   : > { %v679_v32 = vpop.permute.xlu2 %678  ;;  %v867_v18 = vrot.slane %v2686_v25, 1  ;;  %v923_v45 = vrot.slane %v2686_v25, 2 }
  0xcc   : > { %1143 = vrot.lane.b32.xlu1 %v2602_v28, %s2209_s30 }
  0xcd   : > { %1108 = vrot.lane.b32.xlu0 %v863_v31, %s2208_s15  ;;  %v2739_v56 = vsel %vm546_vm1, %v923_v45, %v924_v46 }
  0xce   : > { %v645_v33 = vpop.permute.xlu1 %644 }
  0xcf   : > { %668 = vst.msk [vmem:[#allocation2 + $0x8] sm:$0xff] %vm666_vm6, %v645_v33  ;;  %v643_v3 = vpop.permute.xlu0 %642  ;;  %v830_v33 = vld [vmem:[%s3361_s3 + $0x20] sm:$0xf] }
  0xd0   : > { %667 = vst.msk [vmem:[#allocation2] sm:$0xff] %vm666_vm6, %v643_v3  ;;  %2064 = vmatpush.msk.msra.mxu1 %vm1214_vm9, %v830_v33 }
  0xd1   : > { %703 = vst.msk [vmem:[#allocation2] sm:$0xff] %vm702_vm7, %v679_v32  ;;  %881 = vrot.lane.b32.xlu2 %v860_v22, %s2202_s8  ;;  %v428_v32 = vld [vmem:[%s2630_s27 + $0x28] sm:$0x3] }
  0xd3   : > { %v685_v30 = vpop.permute.xlu2 %684 }
  0xd4   : > { %970 = vrot.lane.b32.xlu1 %v2589_v16, %s2204_s10 }
  0xd5   : > { %937 = vrot.lane.b32.xlu0 %v916_v12, %s2203_s9 }
  0xd6   : > { %v651_v34 = vpop.permute.xlu1 %650 }
  0xd7   : > { %671 = vst.msk [vmem:[#allocation2 + $0x20] sm:$0xff] %vm666_vm6, %v651_v34  ;;  %v649_v35 = vpop.permute.xlu0 %648  ;;  %v448_v34 = vmax.f32 %v428_v32, 0.0 }
  0xd8   : > { %670 = vst.msk [vmem:[#allocation2 + $0x18] sm:$0xff] %vm666_vm6, %v649_v35  ;;  %v829_v35 = vld [vmem:[%s3361_s3 + $0x18] sm:$0xff] }
  0xd9   : > { %706 = vst.msk [vmem:[#allocation2 + $0x18] sm:$0xff] %vm702_vm7, %v685_v30  ;;  %1006 = vrot.lane.b32.xlu2 %v863_v31, %s2205_s11  ;;  %1298 = vmatpush.msra.mxu1 %v829_v35  ;;  %v1414_v58 = vrot.slane %v448_v34, 2 }
  0xdb   : > { %v691_v43 = vpop.permute.xlu2 %690  ;;  %1299 = vmatpush.msra.mxu1 %v828_v36 }
  0xdc   : > { %1074 = vrot.lane.b32.xlu1 %v2623_v38, %s2207_s13 }
  0xdd   : > { %1041 = vrot.lane.b32.xlu0 %v2602_v28, %s2206_s12  ;;  %1300 = vmatpush.msra.mxu1 %v827_v39 }
  0xde   : > { %v657_v44 = vpop.permute.xlu1 %656 }
  0xdf   : > { %674 = vst.msk [vmem:[#allocation2 + $0x38] sm:$0xff] %vm666_vm6, %v657_v44  ;;  %v655_v49 = vpop.permute.xlu0 %654  ;;  %v1358_v44 = vrot.slane %v448_v34, 1  ;;  %1301 = vmatpush.msra.mxu1 %v826_v48 }
  0xe0   : > { %673 = vst.msk [vmem:[#allocation2 + $0x30] sm:$0xff] %vm666_vm6, %v655_v49 }
  0xe1   : > { %709 = vst.msk [vmem:[#allocation2 + $0x30] sm:$0xff] %vm702_vm7, %v691_v43  ;;  %1110 = vrot.lane.b32.xlu2 %v2643_v50, %s2208_s15  ;;  %v1357_v43 = vrot.slane %v2716_v20, 1 }
  0xe3   : > { %v715_v59 = vpop.permute.xlu2 %714  ;;  %v2736_v55 = vsel %vm488_vm0, %v1357_v43, %v1358_v44 }
  0xe4   : > { %883 = vrot.lane.b32.xlu1 %v863_v31, %s2202_s8 }
  0xe5   : > { %1145 = vrot.lane.b32.xlu0 %v2649_v54, %s2209_s30 }
  0xe6   : > { %v683_v60 = vpop.permute.xlu1 %682 }
  0xe7   : > { %705 = vst.msk [vmem:[#allocation2 + $0x10] sm:$0xff] %vm702_vm7, %v683_v60  ;;  %v681_v61 = vpop.permute.xlu0 %680 }
  0xe8   : > { %704 = vst.msk [vmem:[#allocation2 + $0x8] sm:$0xff] %vm702_vm7, %v681_v61 }
  0xe9   : > { %738 = vst.msk [vmem:[#allocation2 + $0x8] sm:$0xff] %vm736_vm8, %v715_v59  ;;  %1375 = vrot.lane.b32.xlu2 %v1353_v62, %s2202_s8  ;;  %v2752_v62 = vsel %vm546_vm1, %v1413_v57, %v1414_v58 }
  0xeb   : > { %v721_v1 = vpop.permute.xlu2 %720 }
  0xec   : > { %1431 = vrot.lane.b32.xlu1 %v1409_v63, %s2203_s9 }
  0xed   : > { %939 = vrot.lane.b32.xlu0 %v2602_v28, %s2203_s9  ;;  %v868_v28 = vrot.slane %v412_v6, 1 }
  0xee   : > { %v689_v2 = vpop.permute.xlu1 %688 }
  0xef   : > { %708 = vst.msk [vmem:[#allocation2 + $0x28] sm:$0xff] %vm702_vm7, %v689_v2  ;;  %v687_v7 = vpop.permute.xlu0 %686  ;;  %v2714_v41 = vsel %vm488_vm0, %v867_v18, %v868_v28 }
  0xf0   : > { %707 = vst.msk [vmem:[#allocation2 + $0x20] sm:$0xff] %vm702_vm7, %v687_v7  ;;  %v2054_v7 = vld [vmem:[%s3361_s3 + $0x48] sm:$0xf] }
  0xf1   : > { %741 = vst.msk [vmem:[#allocation2 + $0x20] sm:$0xff] %vm736_vm8, %v721_v1  ;;  %972 = vrot.lane.b32.xlu2 %v2623_v38, %s2204_s10  ;;  %2055 = vmatpush.msk.msra.mxu0 %vm1214_vm9, %v2054_v7 }
  0xf3   : > { %v727_v12 = vpop.permute.xlu2 %726 }
  0xf4   : > { %1008 = vrot.lane.b32.xlu1 %v2643_v50, %s2205_s11 }
  0xf5   : > { %1464 = vrot.lane.b32.xlu0 %v2671_v8, %s2204_s10 }
  0xf6   : > { %v713_v22 = vpop.permute.xlu1 %712 }
  0xf7   : > { %737 = vst.msk [vmem:[#allocation2] sm:$0xff] %vm736_vm8, %v713_v22  ;;  %v693_v24 = vpop.permute.xlu0 %692  ;;  %v354_v22 = vld [vmem:[%s2548_s29 + $0x58] sm:$0x3] }
  0xf8   : > { %710 = vst.msk [vmem:[#allocation2 + $0x38] sm:$0xff] %vm702_vm7, %v693_v24  ;;  %v414_v6 = vmax.f32 %v354_v22, 0.0 }
  0xf9   : > { %744 = vst.msk [vmem:[#allocation2 + $0x38] sm:$0xff] %vm736_vm8, %v727_v12  ;;  %1500 = vrot.lane.b32.xlu2 %v1356_v26, %s2205_s11  ;;  %v430_v12 = vld [vmem:[%s2630_s27 + $0x38] sm:$0x3] }
  0xfa   : > { %v927_v46 = vrot.slane %v414_v6, 2 }
  0xfb   : > { %v754_v31 = vpop.permute.xlu2 %753 }
  0xfc   : > { %1535 = vrot.lane.b32.xlu1 %v2690_v27, %s2206_s12 }
  0xfd   : > { %1043 = vrot.lane.b32.xlu0 %v2649_v54, %s2206_s12 }
  0xfe   : > { %v719_v3 = vpop.permute.xlu1 %718 }
  0xff   : > { %740 = vst.msk [vmem:[#allocation2 + $0x18] sm:$0xff] %vm736_vm8, %v719_v3  ;;  %v717_v30 = vpop.permute.xlu0 %716  ;;  %v871_v3 = vrot.slane %v414_v6, 1  ;;  %v2073_v6 = vld [vmem:[%s3361_s3 + $0x50] sm:$0xff] }
 0x100   : > { %739 = vst.msk [vmem:[#allocation2 + $0x10] sm:$0xff] %vm736_vm8, %v717_v30 }
 0x101   : > { %776 = vst.msk [vmem:[#allocation2 + $0x10] sm:$0xff] %vm773_vm10, %v754_v31  ;;  %1076 = vrot.lane.b32.xlu2 %v2686_v25, %s2207_s13 }
 0x103   : > { %v760_v47 = vpop.permute.xlu2 %759 }
 0x104   : > { %1112 = vrot.lane.b32.xlu1 %v2714_v41, %s2208_s15 }
 0x105   : > { %1568 = vrot.lane.b32.xlu0 %v2716_v20, %s2207_s13 }
 0x106   : > { %v725_v49 = vpop.permute.xlu1 %724 }
 0x107   : > { %743 = vst.msk [vmem:[#allocation2 + $0x30] sm:$0xff] %vm736_vm8, %v725_v49  ;;  %v723_v53 = vpop.permute.xlu0 %722 }
 0x108   : > { %742 = vst.msk [vmem:[#allocation2 + $0x28] sm:$0xff] %vm736_vm8, %v723_v53 }
 0x109   : > { %779 = vst.msk [vmem:[#allocation2 + $0x28] sm:$0xff] %vm773_vm10, %v760_v47  ;;  %1604 = vrot.lane.b32.xlu2 %v2736_v55, %s2208_s15 }
 0x10b   : > { %v786_v59 = vpop.permute.xlu2 %785 }
 0x10c   : > { %1147 = vrot.lane.b32.xlu1 %v2739_v56, %s2209_s30 }
 0x10d   : > { %793 = vrot.lane.b32.xlu0 %v2412_v17, %s2209_s30 }
 0x10e   : > { %v752_v60 = vpop.permute.xlu1 %751 }
 0x10f   : > { %775 = vst.msk [vmem:[#allocation2 + $0x8] sm:$0xff] %vm773_vm10, %v752_v60  ;;  %v750_v61 = vpop.permute.xlu0 %749 }
 0x110   : > { %774 = vst.msk [vmem:[#allocation2] sm:$0xff] %vm773_vm10, %v750_v61 }
 0x111   : > { %810 = vst.msk [vmem:[#allocation2] sm:$0xff] %vm809_vm11, %v786_v59  ;;  %1639 = vrot.lane.b32.xlu2 %v2752_v62, %s2209_s30 }
 0x113   : > { %v792_v17 = vpop.permute.xlu2 %791 }
 0x114   : > { %1377 = vrot.lane.b32.xlu1 %v1356_v26, %s2202_s8  ;;  %v2808_v26 = vmax.f32 %v429_v15, 0.0 }
 0x115   : > { %885 = vrot.lane.b32.xlu0 %v2643_v50, %s2202_s8 }
 0x116   : > { %v758_v63 = vpop.permute.xlu1 %757  ;;  %v1360_v18 = vrot.slane %v2808_v26, 1 }
 0x117   : > { %778 = vst.msk [vmem:[#allocation2 + $0x20] sm:$0xff] %vm773_vm10, %v758_v63  ;;  %v756_v1 = vpop.permute.xlu0 %755  ;;  %v355_v63 = vld [vmem:[%s2548_s29 + $0x60] sm:$0xff] }
 0x118   : > { %777 = vst.msk [vmem:[#allocation2 + $0x18] sm:$0xff] %vm773_vm10, %v756_v1  ;;  %v818_v2 = vld [vmem:[#allocation2] sm:$0xff]  ;;  %v2900_v7 = vmax.f32 %v355_v63, 0.0 }
 0x119   : > { %813 = vst.msk [vmem:[#allocation2 + $0x18] sm:$0xff] %vm809_vm11, %v792_v17  ;;  %2065 = vmatmul.msk.f32.vlgmr.msra.gmra.mxu1 %vm1189_vm12, %v818_v2  ;;  %941 = vrot.lane.b32.xlu2 %v2649_v54, %s2203_s9  ;;  %v2053_v54 = vld [vmem:[%s3361_s3 + $0x40] sm:$0xff]  ;;  %v432_v2 = vld [vmem:[%s2630_s27 + $0x48] sm:$0x3] }
 0x11a   : > { %831 = vst.msk [vmem:[#allocation2] sm:$0xff] %vm463_vm2, %v2558_v52  ;;  %1230 = vmatpush.msra.mxu0 %v2053_v54  ;;  %v2076_v54 = vld [vmem:[%s3361_s3 + $0x68] sm:$0xff] }
 0x11b   : > { %v969_v50 = vpop.permute.xlu2 %968 }
 0x11c   : > { %974 = vrot.lane.b32.xlu1 %v2686_v25, %s2204_s10  ;;  %1231 = vmatpush.msra.mxu0 %v2052_v11  ;;  %v2075_v11 = vld [vmem:[%s3361_s3 + $0x60] sm:$0xff] }
 0x11d   : > { %1433 = vrot.lane.b32.xlu0 %v2690_v27, %s2203_s9  ;;  %v450_v27 = vmax.f32 %v430_v12, 0.0 }
 0x11e   : > { %v764_v4 = vpop.permute.xlu1 %763  ;;  %1232 = vmatpush.msra.mxu0 %v2051_v9 }
 0x11f   : > { %781 = vst.msk [vmem:[#allocation2 + $0x38] sm:$0xff] %vm773_vm10, %v764_v4  ;;  %v762_v5 = vpop.permute.xlu0 %761  ;;  %v1361_v28 = vrot.slane %v450_v27, 1  ;;  %v1417_v39 = vrot.slane %v450_v27, 2 }
 0x120   : > { %780 = vst.msk [vmem:[#allocation2 + $0x30] sm:$0xff] %vm773_vm10, %v762_v5  ;;  %v2778_v52 = vld [vmem:[#allocation2 + $0x18] sm:$0xff]  ;;  %1233 = vmatpush.msra.mxu0 %v2050_v23  ;;  %v2077_v5 = vld [vmem:[%s3361_s3 + $0x70] sm:$0xf] }
 0x121   : > { %834 = vst.msk [vmem:[#allocation2 + $0x18] sm:$0xff] %vm463_vm2, %v2623_v38  ;;  %1466 = vrot.lane.b32.xlu2 %v2716_v20, %s2204_s10  ;;  %v353_v38 = vld [vmem:[%s2548_s29 + $0x50] sm:$0xff]  ;;  %v2824_v35 = vsel %vm488_vm0, %v1360_v18, %v1361_v28  ;;  %2078 = vmatpush.msk.msra.mxu2 %vm1214_vm9, %v2077_v5  ;;  %v929_v28 = vrot.slane %v2900_v7, 2 }
 0x122   : > { %v2806_v24 = vmax.f32 %v353_v38, 0.0  ;;  %v873_v38 = vrot.slane %v2900_v7, 1 }
 0x123   : > { %v1073_v13 = vpop.permute.xlu2 %1072  ;;  %1724 = vmatpush.msra.mxu2 %v2076_v54 }
 0x124   : > { %1502 = vrot.lane.b32.xlu1 %v2736_v55, %s2205_s11  ;;  %v870_v33 = vrot.slane %v2806_v24, 1  ;;  %v926_v45 = vrot.slane %v2806_v24, 2 }
 0x125   : > { %1010 = vrot.lane.b32.xlu0 %v2714_v41, %s2205_s11  ;;  %1725 = vmatpush.msra.mxu2 %v2075_v11 }
 0x126   : > { %v790_v14 = vpop.permute.xlu1 %789  ;;  %v2828_v36 = vsel %vm488_vm0, %v870_v33, %v871_v3  ;;  %v2849_v48 = vsel %vm546_vm1, %v926_v45, %v927_v46  ;;  %v2978_v46 = vld [vmem:[%s2548_s29 + $0x70] sm:$0xff] }
 0x127   : > { %812 = vst.msk [vmem:[#allocation2 + $0x10] sm:$0xff] %vm809_vm11, %v790_v14  ;;  %v788_v21 = vpop.permute.xlu0 %787  ;;  %v2074_v14 = vld [vmem:[%s3361_s3 + $0x58] sm:$0xff] }
 0x128   : > { %811 = vst.msk [vmem:[#allocation2 + $0x8] sm:$0xff] %vm809_vm11, %v788_v21  ;;  %1726 = vmatpush.msra.mxu2 %v2074_v14 }
 0x129   : > { %1045 = vrot.lane.b32.xlu2 %v2739_v56, %s2206_s12 }
 0x12a   : > { %1727 = vmatpush.msra.mxu2 %v2073_v6 }
 0x12b   : > { %v882_v31 = vpop.permute.xlu2 %881 }
 0x12c   : > { %1078 = vrot.lane.b32.xlu1 %v2806_v24, %s2207_s13 }
 0x12d   : > { %1537 = vrot.lane.b32.xlu0 %v2752_v62, %s2206_s12 }
 0x12e   : > { %v936_v32 = vpop.permute.xlu1 %935  ;;  %v820_v10 = vld [vmem:[#allocation2 + $0x10] sm:$0xff] }
 0x12f   : > { %v880_v30 = vpop.permute.xlu0 %879  ;;  %v819_v34 = vld [vmem:[#allocation2 + $0x8] sm:$0xff]  ;;  %833 = vst.msk [vmem:[#allocation2 + $0x10] sm:$0xff] %vm463_vm2, %v2589_v16  ;;  %v1416_v16 = vrot.slane %v2808_v26, 2 }
 0x130   : > { %903 = vst.msk [vmem:[#allocation2] sm:$0xff] %vm537_vm3, %v880_v30  ;;  %2066 = vmatmul.msk.f32.gmra.mxu1 %vm1189_vm12, %v819_v34 }
 0x131   : > { %959 = vst.msk [vmem:[#allocation2] sm:$0xff] %vm595_vm4, %v936_v32  ;;  %1570 = vrot.lane.b32.xlu2 %v2808_v26, %s2207_s13  ;;  %v2845_v47 = vsel %vm546_vm1, %v1416_v16, %v1417_v39 }
 0x132   : > { %992 = vst.msk [vmem:[#allocation2] sm:$0xff] %vm629_vm5, %v969_v50 }
 0x133   : > { %832 = vst.msk [vmem:[#allocation2 + $0x8] sm:$0xff] %vm463_vm2, %v2574_v0  ;;  %v1007_v43 = vpop.permute.xlu2 %1006 }
 0x134   : > { %1606 = vrot.lane.b32.xlu1 %v2824_v35, %s2208_s15  ;;  %904 = vst.msk [vmem:[#allocation2 + $0x8] sm:$0xff] %vm537_vm3, %v882_v31 }
 0x135   : > { %1114 = vrot.lane.b32.xlu0 %v2828_v36, %s2208_s15 }
 0x136   : > { %v1040_v44 = vpop.permute.xlu1 %1039 }
 0x137   : > { %v1005_v0 = vpop.permute.xlu0 %1004 }
 0x138   : > { %1028 = vst.msk [vmem:[#allocation2] sm:$0xff] %vm666_vm6, %v1005_v0  ;;  %2067 = vmatmul.msk.f32.gmra.mxu1 %vm1189_vm12, %v820_v10  ;;  %v2981_v0 = vld [vmem:[%s2548_s29 + $0x78] sm:$0x3] }
 0x139   : > { %1063 = vst.msk [vmem:[#allocation2] sm:$0xff] %vm702_vm7, %v1040_v44  ;;  %795 = vrot.lane.b32.xlu2 %v2415_v19, %s2209_s30 }
 0x13a   : > { %1096 = vst.msk [vmem:[#allocation2] sm:$0xff] %vm736_vm8, %v1073_v13 }
 0x13b   : > { %v1111_v49 = vpop.permute.xlu2 %1110 }
 0x13c   : > { %1641 = vrot.lane.b32.xlu1 %v2845_v47, %s2209_s30 }
 0x13d   : > { %1149 = vrot.lane.b32.xlu0 %v2849_v48, %s2209_s30 }
 0x13e   : > { %v1144_v53 = vpop.permute.xlu1 %1143 }
 0x13f   : > { %v1109_v57 = vpop.permute.xlu0 %1108 }
 0x140   : > { %1132 = vst.msk [vmem:[#allocation2] sm:$0xff] %vm773_vm10, %v1109_v57  ;;  %2068 = vmatmul.msk.f32.gmra.mxu1 %vm1189_vm12, %v2778_v52  ;;  %v452_v52 = vmax.f32 %v432_v2, 0.0 }
 0x141   : > { %1167 = vst.msk [vmem:[#allocation2] sm:$0xff] %vm809_vm11, %v1144_v53  ;;  %887 = vrot.lane.b32.xlu2 %v2714_v41, %s2202_s8  ;;  %v418_v53 = vmax.f32 %v2981_v0, 0.0 }
 0x142   : > { %v1364_v21 = vrot.slane %v452_v52, 1 }
 0x143   : > { %v1376_v19 = vpop.permute.xlu2 %1375 }
 0x144   : > { %943 = vrot.lane.b32.xlu1 %v2739_v56, %s2203_s9 }
 0x145   : > { %1379 = vrot.lane.b32.xlu0 %v2736_v55, %s2202_s8 }
 0x146   : > { %v971_v58 = vpop.permute.xlu1 %970 }
 0x147   : > { %v938_v59 = vpop.permute.xlu0 %937 }
 0x148   : > { %960 = vst.msk [vmem:[#allocation2 + $0x8] sm:$0xff] %vm595_vm4, %v938_v59  ;;  %v1175_v60 = vld [vmem:[#allocation2] sm:$0xff]  ;;  %v434_v59 = vld [vmem:[%s2630_s27 + $0x58] sm:$0x3] }
 0x149   : > { %993 = vst.msk [vmem:[#allocation2 + $0x8] sm:$0xff] %vm629_vm5, %v971_v58  ;;  %2056 = vmatmul.msk.f32.vlgmr.msra.gmra.mxu0 %vm1189_vm12, %v1175_v60  ;;  %1435 = vrot.lane.b32.xlu2 %v2752_v62, %s2203_s9  ;;  %v356_v62 = vld [vmem:[%s2548_s29 + $0x68] sm:$0x3] }
 0x14a   : > { %1029 = vst.msk [vmem:[#allocation2 + $0x8] sm:$0xff] %vm666_vm6, %v1007_v43  ;;  %v416_v4 = vmax.f32 %v356_v62, 0.0 }
 0x14b   : > { %1327 = vst.msk [vmem:[#allocation2] sm:$0xff] %vm463_vm2, %v2646_v51  ;;  %v973_v41 = vpop.permute.xlu2 %972  ;;  %v431_v51 = vld [vmem:[%s2630_s27 + $0x40] sm:$0xff] }
 0x14c   : > { %1468 = vrot.lane.b32.xlu1 %v2808_v26, %s2204_s10  ;;  %1399 = vst.msk [vmem:[#allocation2] sm:$0xff] %vm537_vm3, %v1376_v19  ;;  %v2895_v50 = vmax.f32 %v431_v51, 0.0  ;;  %v874_v13 = vrot.slane %v416_v4, 1  ;;  %v930_v31 = vrot.slane %v416_v4, 2  ;;  %v877_v19 = vrot.slane %v418_v53, 1 }
 0x14d   : > { %976 = vrot.lane.b32.xlu0 %v2806_v24, %s2204_s10  ;;  %v933_v4 = vrot.slane %v418_v53, 2 }
 0x14e   : > { %v1075_v55 = vpop.permute.xlu1 %1074  ;;  %v1363_v12 = vrot.slane %v2895_v50, 1  ;;  %v2924_v27 = vsel %vm488_vm0, %v873_v38, %v874_v13  ;;  %v1419_v3 = vrot.slane %v2895_v50, 2  ;;  %v2946_v30 = vsel %vm546_vm1, %v929_v28, %v930_v31 }
 0x14f   : > { %v1042_v56 = vpop.permute.xlu0 %1041 }
 0x150   : > { %1064 = vst.msk [vmem:[#allocation2 + $0x8] sm:$0xff] %vm702_vm7, %v1042_v56  ;;  %v2933_v18 = vsel %vm488_vm0, %v1363_v12, %v1364_v21 }
 0x151   : > { %1097 = vst.msk [vmem:[#allocation2 + $0x8] sm:$0xff] %vm736_vm8, %v1075_v55  ;;  %1012 = vrot.lane.b32.xlu2 %v2828_v36, %s2205_s11  ;;  %v433_v55 = vld [vmem:[%s2630_s27 + $0x50] sm:$0xff] }
 0x152   : > { %1133 = vst.msk [vmem:[#allocation2 + $0x8] sm:$0xff] %vm773_vm10, %v1111_v49  ;;  %v2986_v49 = vmax.f32 %v2978_v46, 0.0 }
 0x153   : > { %v1501_v61 = vpop.permute.xlu2 %1500 }
 0x154   : > { %1047 = vrot.lane.b32.xlu1 %v2849_v48, %s2206_s12  ;;  %v876_v57 = vrot.slane %v2986_v49, 1  ;;  %v932_v2 = vrot.slane %v2986_v49, 2 }
 0x155   : > { %1504 = vrot.lane.b32.xlu0 %v2824_v35, %s2205_s11 }
 0x156   : > { %v884_v17 = vpop.permute.xlu1 %883  ;;  %v3005_v62 = vsel %vm488_vm0, %v876_v57, %v877_v19  ;;  %v3031_v38 = vsel %vm546_vm1, %v932_v2, %v933_v4 }
 0x157   : > { %905 = vst.msk [vmem:[#allocation2 + $0x10] sm:$0xff] %vm537_vm3, %v884_v17  ;;  %v1146_v1 = vpop.permute.xlu0 %1145  ;;  %v3007_v17 = vmax.f32 %v433_v55, 0.0 }
 0x158   : > { %1168 = vst.msk [vmem:[#allocation2 + $0x8] sm:$0xff] %vm809_vm11, %v1146_v1 }
 0x159   : > { %1539 = vrot.lane.b32.xlu2 %v2845_v47, %s2206_s12  ;;  %v1366_v63 = vrot.slane %v3007_v17, 1 }
 0x15b   : > { %v1077_v9 = vpop.permute.xlu2 %1076 }
 0x15c   : > { %1572 = vrot.lane.b32.xlu1 %v2895_v50, %s2207_s13 }
 0x15d   : > { %1080 = vrot.lane.b32.xlu0 %v2900_v7, %s2207_s13 }
 0x15e   : > { %v1432_v15 = vpop.permute.xlu1 %1431 }
 0x15f   : > { %1455 = vst.msk [vmem:[#allocation2] sm:$0xff] %vm595_vm4, %v1432_v15  ;;  %v940_v22 = vpop.permute.xlu0 %939  ;;  %v1176_v23 = vld [vmem:[#allocation2 + $0x8] sm:$0xff] }
 0x160   : > { %961 = vst.msk [vmem:[#allocation2 + $0x10] sm:$0xff] %vm595_vm4, %v940_v22  ;;  %2057 = vmatmul.msk.f32.gmra.mxu0 %vm1189_vm12, %v1176_v23 }
 0x161   : > { %994 = vst.msk [vmem:[#allocation2 + $0x10] sm:$0xff] %vm629_vm5, %v973_v41  ;;  %1116 = vrot.lane.b32.xlu2 %v2924_v27, %s2208_s15 }
 0x162   : > { %1328 = vst.msk [vmem:[#allocation2 + $0x8] sm:$0xff] %vm463_vm2, %v2671_v8  ;;  %v1420_v8 = vrot.slane %v452_v52, 2  ;;  %v782_v52 = vrot.slane %v2512_v37, 2  ;;  %v1422_v37 = vrot.slane %v3007_v17, 2 }
 0x163   : > { %v1605_v32 = vpop.permute.xlu2 %1604 }
 0x164   : > { %797 = vrot.lane.b32.xlu1 %v2486_v29, %s2209_s30  ;;  %v2950_v29 = vsel %vm546_vm1, %v1419_v3, %v1420_v8  ;;  %v3081_v8 = vld [vmem:[%s2548_s29 + $0x88] sm:$0x3] }
 0x165   : > { %1608 = vrot.lane.b32.xlu0 %v2933_v18, %s2208_s15 }
 0x166   : > { %v1009_v33 = vpop.permute.xlu1 %1008 }
 0x167   : > { %1030 = vst.msk [vmem:[#allocation2 + $0x10] sm:$0xff] %vm666_vm6, %v1009_v33  ;;  %v1465_v10 = vpop.permute.xlu0 %1464  ;;  %v436_v33 = vld [vmem:[%s2630_s27 + $0x68] sm:$0x3] }
 0x168   : > { %1488 = vst.msk [vmem:[#allocation2] sm:$0xff] %vm629_vm5, %v1465_v10 }
 0x169   : > { %1524 = vst.msk [vmem:[#allocation2] sm:$0xff] %vm666_vm6, %v1501_v61  ;;  %1151 = vrot.lane.b32.xlu2 %v2946_v30, %s2209_s30  ;;  %v454_v61 = vmax.f32 %v434_v59, 0.0 }
 0x16b   : > { %v1640_v34 = vpop.permute.xlu2 %1639  ;;  %v1367_v1 = vrot.slane %v454_v61, 1  ;;  %v1423_v40 = vrot.slane %v454_v61, 2 }
 0x16c   : > { %889 = vrot.lane.b32.xlu1 %v2828_v36, %s2202_s8 }
 0x16d   : > { %1643 = vrot.lane.b32.xlu0 %v2950_v29, %s2209_s30  ;;  %v3027_v11 = vsel %vm488_vm0, %v1366_v63, %v1367_v1  ;;  %v3044_v15 = vsel %vm546_vm1, %v1422_v37, %v1423_v40 }
 0x16e   : > { %v1536_v16 = vpop.permute.xlu1 %1535 }
 0x16f   : > { %1559 = vst.msk [vmem:[#allocation2] sm:$0xff] %vm702_vm7, %v1536_v16  ;;  %v1044_v39 = vpop.permute.xlu0 %1043 }
 0x170   : > { %1065 = vst.msk [vmem:[#allocation2 + $0x10] sm:$0xff] %vm702_vm7, %v1044_v39 }
 0x171   : > { %1098 = vst.msk [vmem:[#allocation2 + $0x10] sm:$0xff] %vm736_vm8, %v1077_v9  ;;  %1381 = vrot.lane.b32.xlu2 %v2824_v35, %s2202_s8 }
 0x173   : > { %v942_v36 = vpop.permute.xlu2 %941 }
 0x174   : > { %1437 = vrot.lane.b32.xlu1 %v2845_v47, %s2203_s9 }
 0x175   : > { %945 = vrot.lane.b32.xlu0 %v2849_v48, %s2203_s9 }
 0x176   : > { %v1113_v43 = vpop.permute.xlu1 %1112 }
 0x177   : > { %1134 = vst.msk [vmem:[#allocation2 + $0x10] sm:$0xff] %vm773_vm10, %v1113_v43  ;;  %v1569_v44 = vpop.permute.xlu0 %1568 }
 0x178   : > { %1592 = vst.msk [vmem:[#allocation2] sm:$0xff] %vm736_vm8, %v1569_v44 }
 0x179   : > { %1628 = vst.msk [vmem:[#allocation2] sm:$0xff] %vm773_vm10, %v1605_v32  ;;  %978 = vrot.lane.b32.xlu2 %v2900_v7, %s2204_s10  ;;  %v435_v32 = vld [vmem:[%s2630_s27 + $0x60] sm:$0xff] }
 0x17a   : > { %1663 = vst.msk [vmem:[#allocation2] sm:$0xff] %vm809_vm11, %v1640_v34  ;;  %v420_v34 = vmax.f32 %v3081_v8, 0.0 }
 0x17b   : > { %v1467_v35 = vpop.permute.xlu2 %1466 }
 0x17c   : > { %1014 = vrot.lane.b32.xlu1 %v2924_v27, %s2205_s11 }
 0x17d   : > { %1470 = vrot.lane.b32.xlu0 %v2895_v50, %s2204_s10 }
 0x17e   : > { %v1148_v45 = vpop.permute.xlu1 %1147 }
 0x17f   : > { %1169 = vst.msk [vmem:[#allocation2 + $0x10] sm:$0xff] %vm809_vm11, %v1148_v45  ;;  %v794_v47 = vpop.permute.xlu0 %793  ;;  %v1002_v45 = vrot.slane %v420_v34, 1 }
 0x180   : > { %814 = vst.msk [vmem:[#allocation2 + $0x20] sm:$0xff] %vm809_vm11, %v794_v47 }
 0x181   : > { %v1671_v48 = vld [vmem:[#allocation2] sm:$0xff]  ;;  %1506 = vrot.lane.b32.xlu2 %v2933_v18, %s2205_s11 }
 0x182   : > { %2079 = vmatmul.msk.f32.vlgmr.msra.gmra.mxu2 %vm1189_vm12, %v1671_v48 }
 0x183   : > { %v1046_v58 = vpop.permute.xlu2 %1045 }
 0x184   : > { %1541 = vrot.lane.b32.xlu1 %v2950_v29, %s2206_s12 }
 0x185   : > { %1049 = vrot.lane.b32.xlu0 %v2946_v30, %s2206_s12 }
 0x186   : > { %v1378_v60 = vpop.permute.xlu1 %1377  ;;  %v1177_v41 = vld [vmem:[#allocation2 + $0x10] sm:$0xff] }
 0x187   : > { %1400 = vst.msk [vmem:[#allocation2 + $0x8] sm:$0xff] %vm537_vm3, %v1378_v60  ;;  %v886_v56 = vpop.permute.xlu0 %885  ;;  %2058 = vmatmul.msk.f32.gmra.mxu0 %vm1189_vm12, %v1177_v41  ;;  %v822_v51 = vld [vmem:[#allocation2 + $0x20] sm:$0xff] }
 0x188   : > { %906 = vst.msk [vmem:[#allocation2 + $0x18] sm:$0xff] %vm537_vm3, %v886_v56  ;;  %2069 = vmatmul.msk.f32.gmra.mxu1 %vm1189_vm12, %v822_v51 }
 0x189   : > { %962 = vst.msk [vmem:[#allocation2 + $0x18] sm:$0xff] %vm595_vm4, %v942_v36  ;;  %1082 = vrot.lane.b32.xlu2 %v2986_v49, %s2207_s13 }
 0x18a   : > { %1329 = vst.msk [vmem:[#allocation2 + $0x10] sm:$0xff] %vm463_vm2, %v2716_v20 }
 0x18b   : > { %835 = vst.msk [vmem:[#allocation2 + $0x20] sm:$0xff] %vm463_vm2, %v2686_v25  ;;  %v1571_v5 = vpop.permute.xlu2 %1570  ;;  %v783_v25 = vrot.slane %v402_v42, 2 }
 0x18c   : > { %1118 = vrot.lane.b32.xlu1 %v3005_v62, %s2208_s15 }
 0x18d   : > { %1574 = vrot.lane.b32.xlu0 %v3007_v17, %s2207_s13  ;;  %v784_v13 = vsel %vm546_vm1, %v782_v52, %v783_v25  ;;  %v361_v52 = vld [vmem:[%s2548_s29 + $0x90] sm:$0xff]  ;;  %v362_v25 = vld [vmem:[%s2548_s29 + $0x98] sm:$0x3] }
 0x18e   : > { %v975_v20 = vpop.permute.xlu1 %974 }
 0x18f   : > { %995 = vst.msk [vmem:[#allocation2 + $0x18] sm:$0xff] %vm629_vm5, %v975_v20  ;;  %v1434_v54 = vpop.permute.xlu0 %1433 }
 0x190   : > { %1456 = vst.msk [vmem:[#allocation2 + $0x8] sm:$0xff] %vm595_vm4, %v1434_v54 }
 0x191   : > { %1489 = vst.msk [vmem:[#allocation2 + $0x8] sm:$0xff] %vm629_vm5, %v1467_v35  ;;  %1610 = vrot.lane.b32.xlu2 %v3027_v11, %s2208_s15 }
 0x193   : > { %v796_v42 = vpop.permute.xlu2 %795 }
 0x194   : > { %1153 = vrot.lane.b32.xlu1 %v3031_v38, %s2209_s30  ;;  %815 = vst.msk [vmem:[#allocation2 + $0x28] sm:$0xff] %vm809_vm11, %v796_v42 }
 0x195   : > { %799 = vrot.lane.b32.xlu0 %v784_v13, %s2209_s30  ;;  %v422_v13 = vmax.f32 %v362_v25, 0.0 }
 0x196   : > { %v1503_v9 = vpop.permute.xlu1 %1502 }
 0x197   : > { %1525 = vst.msk [vmem:[#allocation2 + $0x8] sm:$0xff] %vm666_vm6, %v1503_v9  ;;  %v1011_v14 = vpop.permute.xlu0 %1010  ;;  %v1106_v40 = vrot.slane %v422_v13, 1 }
 0x198   : > { %1031 = vst.msk [vmem:[#allocation2 + $0x18] sm:$0xff] %vm666_vm6, %v1011_v14 }
 0x199   : > { %1066 = vst.msk [vmem:[#allocation2 + $0x18] sm:$0xff] %vm702_vm7, %v1046_v58  ;;  %1645 = vrot.lane.b32.xlu2 %v3044_v15, %s2209_s30  ;;  %v1037_v58 = vrot.slane %v420_v34, 2  ;;  %v1769_v34 = vld [vmem:[%s3362_s4] sm:$0xf] }
 0x19a   : > { %2087 = vmatpush.msk.msra.mxu3 %vm1214_vm9, %v1769_v34 }
 0x19b   : > { %v888_v12 = vpop.permute.xlu2 %887  ;;  %v823_v21 = vld [vmem:[#allocation2 + $0x28] sm:$0xff] }
 0x19c   : > { %1383 = vrot.lane.b32.xlu1 %v2933_v18, %s2202_s8  ;;  %907 = vst.msk [vmem:[#allocation2 + $0x20] sm:$0xff] %vm537_vm3, %v888_v12  ;;  %2070 = vmatmul.msk.f32.gmra.mxu1 %vm1189_vm12, %v823_v21  ;;  %v438_v12 = vld [vmem:[%s2630_s27 + $0x78] sm:$0x3] }
 0x19d   : > { %891 = vrot.lane.b32.xlu0 %v2924_v27, %s2202_s8  ;;  %836 = vst.msk [vmem:[#allocation2 + $0x28] sm:$0xff] %vm463_vm2, %v2806_v24  ;;  %v3075_v24 = vld [vmem:[%s2548_s29 + $0x80] sm:$0xff] }
 0x19e   : > { %v1079_v22 = vpop.permute.xlu1 %1078  ;;  %v419_v10 = vmax.f32 %v3075_v24, 0.0 }
 0x19f   : > { %1099 = vst.msk [vmem:[#allocation2 + $0x18] sm:$0xff] %vm736_vm8, %v1079_v22  ;;  %v1538_v23 = vpop.permute.xlu0 %1537 }
 0x1a0   : > { %1560 = vst.msk [vmem:[#allocation2 + $0x8] sm:$0xff] %vm702_vm7, %v1538_v23  ;;  %v1001_v35 = vrot.slane %v419_v10, 1  ;;  %v1036_v19 = vrot.slane %v419_v10, 2  ;;  %v458_v23 = vmax.f32 %v438_v12, 0.0 }
 0x1a1   : > { %1593 = vst.msk [vmem:[#allocation2 + $0x8] sm:$0xff] %vm736_vm8, %v1571_v5  ;;  %947 = vrot.lane.b32.xlu2 %v2946_v30, %s2203_s9  ;;  %v3085_v30 = vmax.f32 %v435_v32, 0.0 }
 0x1a2   : > { %v1003_v57 = vsel %vm488_vm0, %v1001_v35, %v1002_v45  ;;  %v1038_v56 = vsel %vm546_vm1, %v1036_v19, %v1037_v58  ;;  %v439_v35 = vld [vmem:[%s2630_s27 + $0x80] sm:$0xff] }
 0x1a3   : > { %v1436_v27 = vpop.permute.xlu2 %1435  ;;  %v1369_v16 = vrot.slane %v3085_v30, 1  ;;  %v1425_v41 = vrot.slane %v3085_v30, 2  ;;  %v459_v19 = vmax.f32 %v439_v35, 0.0 }
 0x1a4   : > { %980 = vrot.lane.b32.xlu1 %v2986_v49, %s2204_s10 }
 0x1a5   : > { %1439 = vrot.lane.b32.xlu0 %v2950_v29, %s2203_s9  ;;  %v456_v29 = vmax.f32 %v436_v33, 0.0  ;;  %v1141_v33 = vrot.slane %v422_v13, 2 }
 0x1a6   : > { %v1607_v6 = vpop.permute.xlu1 %1606 }
 0x1a7   : > { %1629 = vst.msk [vmem:[#allocation2 + $0x8] sm:$0xff] %vm773_vm10, %v1607_v6  ;;  %v1115_v18 = vpop.permute.xlu0 %1114  ;;  %v1370_v39 = vrot.slane %v456_v29, 1  ;;  %v1426_v55 = vrot.slane %v456_v29, 2  ;;  %v1373_v6 = vrot.slane %v458_v23, 1 }
 0x1a8   : > { %1135 = vst.msk [vmem:[#allocation2 + $0x18] sm:$0xff] %vm773_vm10, %v1115_v18 }
 0x1a9   : > { %1472 = vrot.lane.b32.xlu2 %v3007_v17, %s2204_s10  ;;  %v3100_v53 = vsel %vm488_vm0, %v1369_v16, %v1370_v39  ;;  %v3116_v51 = vsel %vm546_vm1, %v1425_v41, %v1426_v55  ;;  %v1497_v55 = vrot.slane %v459_v19, 1 }
 0x1ab   : > { %v1013_v28 = vpop.permute.xlu2 %1012 }
 0x1ac   : > { %1508 = vrot.lane.b32.xlu1 %v3027_v11, %s2205_s11 }
 0x1ad   : > { %1016 = vrot.lane.b32.xlu0 %v3005_v62, %s2205_s11 }
 0x1ae   : > { %v1642_v31 = vpop.permute.xlu1 %1641 }
 0x1af   : > { %1664 = vst.msk [vmem:[#allocation2 + $0x8] sm:$0xff] %vm809_vm11, %v1642_v31  ;;  %v1150_v3 = vpop.permute.xlu0 %1149 }
 0x1b0   : > { %1170 = vst.msk [vmem:[#allocation2 + $0x18] sm:$0xff] %vm809_vm11, %v1150_v3 }
 0x1b1   : > { %1051 = vrot.lane.b32.xlu2 %v3031_v38, %s2206_s12 }
 0x1b3   : > { %v1540_v36 = vpop.permute.xlu2 %1539 }
 0x1b4   : > { %1084 = vrot.lane.b32.xlu1 %v419_v10, %s2207_s13 }
 0x1b5   : > { %1543 = vrot.lane.b32.xlu0 %v3044_v15, %s2206_s12 }
 0x1b6   : > { %v944_v43 = vpop.permute.xlu1 %943  ;;  %v1672_v44 = vld [vmem:[#allocation2 + $0x8] sm:$0xff] }
 0x1b7   : > { %963 = vst.msk [vmem:[#allocation2 + $0x20] sm:$0xff] %vm595_vm4, %v944_v43  ;;  %v1380_v47 = vpop.permute.xlu0 %1379  ;;  %v1178_v48 = vld [vmem:[#allocation2 + $0x18] sm:$0xff]  ;;  %2080 = vmatmul.msk.f32.gmra.mxu2 %vm1189_vm12, %v1672_v44 }
 0x1b8   : > { %1401 = vst.msk [vmem:[#allocation2 + $0x10] sm:$0xff] %vm537_vm3, %v1380_v47  ;;  %2059 = vmatmul.msk.f32.gmra.mxu0 %vm1189_vm12, %v1178_v48 }
 0x1b9   : > { %1457 = vst.msk [vmem:[#allocation2 + $0x10] sm:$0xff] %vm595_vm4, %v1436_v27  ;;  %1576 = vrot.lane.b32.xlu2 %v3085_v30, %s2207_s13 }
 0x1ba   : > { %1330 = vst.msk [vmem:[#allocation2 + $0x18] sm:$0xff] %vm463_vm2, %v2808_v26 }
 0x1bb   : > { %v1117_v59 = vpop.permute.xlu2 %1116 }
 0x1bc   : > { %1612 = vrot.lane.b32.xlu1 %v3100_v53, %s2208_s15 }
 0x1bd   : > { %1120 = vrot.lane.b32.xlu0 %v1003_v57, %s2208_s15 }
 0x1be   : > { %v1469_v60 = vpop.permute.xlu1 %1468 }
 0x1bf   : > { %1490 = vst.msk [vmem:[#allocation2 + $0x10] sm:$0xff] %vm629_vm5, %v1469_v60  ;;  %v977_v26 = vpop.permute.xlu0 %976  ;;  %v1532_v60 = vrot.slane %v459_v19, 2 }
 0x1c0   : > { %996 = vst.msk [vmem:[#allocation2 + $0x20] sm:$0xff] %vm629_vm5, %v977_v26 }
 0x1c1   : > { %1032 = vst.msk [vmem:[#allocation2 + $0x20] sm:$0xff] %vm666_vm6, %v1013_v28  ;;  %1155 = vrot.lane.b32.xlu2 %v1038_v56, %s2209_s30  ;;  %v1429_v28 = vrot.slane %v458_v23, 2 }
 0x1c3   : > { %v1152_v61 = vpop.permute.xlu2 %1151 }
 0x1c4   : > { %893 = vrot.lane.b32.xlu1 %v3005_v62, %s2202_s8 }
 0x1c5   : > { %1647 = vrot.lane.b32.xlu0 %v3116_v51, %s2209_s30 }
 0x1c6   : > { %v1048_v63 = vpop.permute.xlu1 %1047 }
 0x1c7   : > { %1067 = vst.msk [vmem:[#allocation2 + $0x20] sm:$0xff] %vm702_vm7, %v1048_v63  ;;  %v1505_v1 = vpop.permute.xlu0 %1504 }
 0x1c8   : > { %1526 = vst.msk [vmem:[#allocation2 + $0x10] sm:$0xff] %vm666_vm6, %v1505_v1  ;;  %v1303_v1 = vpop.f32.mrf.mxu1 }
 0x1c9   : > { %1561 = vst.msk [vmem:[#allocation2 + $0x10] sm:$0xff] %vm702_vm7, %v1540_v36  ;;  %1385 = vrot.lane.b32.xlu2 %v3027_v11, %s2202_s8 }
 0x1cb   : > { %v1382_v62 = vpop.permute.xlu2 %1381 }
 0x1cc   : > { %1441 = vrot.lane.b32.xlu1 %v3044_v15, %s2203_s9  ;;  %1402 = vst.msk [vmem:[#allocation2 + $0x18] sm:$0xff] %vm537_vm3, %v1382_v62  ;;  %v437_v15 = vld [vmem:[%s2630_s27 + $0x70] sm:$0xff] }
 0x1cd   : > { %949 = vrot.lane.b32.xlu0 %v3031_v38, %s2203_s9  ;;  %v421_v38 = vmax.f32 %v361_v52, 0.0  ;;  %v3161_v22 = vmax.f32 %v437_v15, 0.0  ;;  %v442_v52 = vld [vmem:[%s2630_s27 + $0x98] sm:$0x3] }
 0x1ce   : > { %v1573_v2 = vpop.permute.xlu1 %1572 }
 0x1cf   : > { %1594 = vst.msk [vmem:[#allocation2 + $0x10] sm:$0xff] %vm736_vm8, %v1573_v2  ;;  %v1081_v4 = vpop.permute.xlu0 %1080  ;;  %v1105_v37 = vrot.slane %v421_v38, 1  ;;  %v1372_v27 = vrot.slane %v3161_v22, 1  ;;  %v1428_v18 = vrot.slane %v3161_v22, 2  ;;  %v1140_v32 = vrot.slane %v421_v38, 2 }
 0x1d0   : > { %1100 = vst.msk [vmem:[#allocation2 + $0x20] sm:$0xff] %vm736_vm8, %v1081_v4 }
 0x1d1   : > { %1136 = vst.msk [vmem:[#allocation2 + $0x20] sm:$0xff] %vm773_vm10, %v1117_v59  ;;  %982 = vrot.lane.b32.xlu2 %v419_v10, %s2204_s10  ;;  %v1374_v29 = vsel %vm488_vm0, %v1372_v27, %v1373_v6  ;;  %v1430_v16 = vsel %vm546_vm1, %v1428_v18, %v1429_v28  ;;  %v1142_v39 = vsel %vm546_vm1, %v1140_v32, %v1141_v33 }
 0x1d2   : > { %1171 = vst.msk [vmem:[#allocation2 + $0x20] sm:$0xff] %vm809_vm11, %v1152_v61 }
 0x1d3   : > { %v979_v5 = vpop.permute.xlu2 %978 }
 0x1d4   : > { %1018 = vrot.lane.b32.xlu1 %v1003_v57, %s2205_s11  ;;  %v440_v57 = vld [vmem:[%s2630_s27 + $0x88] sm:$0x3] }
 0x1d5   : > { %1474 = vrot.lane.b32.xlu0 %v3085_v30, %s2204_s10  ;;  %v460_v58 = vmax.f32 %v440_v57, 0.0 }
 0x1d6   : > { %v798_v20 = vpop.permute.xlu1 %797 }
 0x1d7   : > { %816 = vst.msk [vmem:[#allocation2 + $0x30] sm:$0xff] %vm809_vm11, %v798_v20  ;;  %v1609_v54 = vpop.permute.xlu0 %1608  ;;  %v1533_v41 = vrot.slane %v460_v58, 2  ;;  %v1498_v26 = vrot.slane %v460_v58, 1  ;;  %v441_v20 = vld [vmem:[%s2630_s27 + $0x90] sm:$0xff] }
 0x1d8   : > { %1630 = vst.msk [vmem:[#allocation2 + $0x10] sm:$0xff] %vm773_vm10, %v1609_v54  ;;  %v461_v13 = vmax.f32 %v441_v20, 0.0 }
 0x1d9   : > { %v1179_v11 = vld [vmem:[#allocation2 + $0x20] sm:$0xff]  ;;  %1510 = vrot.lane.b32.xlu2 %v3100_v53, %s2205_s11  ;;  %v1534_v61 = vsel %vm546_vm1, %v1532_v60, %v1533_v41  ;;  %v1499_v63 = vsel %vm488_vm0, %v1497_v55, %v1498_v26 }
 0x1da   : > { %2060 = vmatmul.msk.f32.gmra.mxu0 %vm1189_vm12, %v1179_v11  ;;  %1331 = vst.msk [vmem:[#allocation2 + $0x20] sm:$0xff] %vm463_vm2, %v2895_v50  ;;  %v1107_v50 = vsel %vm488_vm0, %v1105_v37, %v1106_v40  ;;  %v462_v37 = vmax.f32 %v442_v52, 0.0  ;;  %v1601_v40 = vrot.slane %v461_v13, 1  ;;  %v1636_v23 = vrot.slane %v461_v13, 2 }
 0x1db   : > { %v1507_v42 = vpop.permute.xlu2 %1506 }
 0x1dc   : > { %1545 = vrot.lane.b32.xlu1 %v3116_v51, %s2206_s12  ;;  %v1637_v27 = vrot.slane %v462_v37, 2 }
 0x1dd   : > { %1053 = vrot.lane.b32.xlu0 %v1038_v56, %s2206_s12 }
 0x1de   : > { %v890_v9 = vpop.permute.xlu1 %889  ;;  %v824_v14 = vld [vmem:[#allocation2 + $0x30] sm:$0xff] }
 0x1df   : > { %908 = vst.msk [vmem:[#allocation2 + $0x28] sm:$0xff] %vm537_vm3, %v890_v9  ;;  %v1644_v21 = vpop.permute.xlu0 %1643  ;;  %2071 = vmatmul.msk.f32.gmra.mxu1 %vm1189_vm12, %v824_v14 }
 0x1e0   : > { %1665 = vst.msk [vmem:[#allocation2 + $0x10] sm:$0xff] %vm809_vm11, %v1644_v21 }
 0x1e1   : > { %837 = vst.msk [vmem:[#allocation2 + $0x30] sm:$0xff] %vm463_vm2, %v2900_v7  ;;  %1086 = vrot.lane.b32.xlu2 %v421_v38, %s2207_s13 }
 0x1e3   : > { %v1083_v31 = vpop.permute.xlu2 %1082 }
 0x1e4   : > { %1122 = vrot.lane.b32.xlu1 %v1107_v50, %s2208_s15 }
 0x1e5   : > { %1578 = vrot.lane.b32.xlu0 %v3161_v22, %s2207_s13 }
 0x1e6   : > { %v1438_v7 = vpop.permute.xlu1 %1437 }
 0x1e7   : > { %1458 = vst.msk [vmem:[#allocation2 + $0x18] sm:$0xff] %vm595_vm4, %v1438_v7  ;;  %v946_v3 = vpop.permute.xlu0 %945  ;;  %v1673_v10 = vld [vmem:[#allocation2 + $0x10] sm:$0xff] }
 0x1e8   : > { %964 = vst.msk [vmem:[#allocation2 + $0x28] sm:$0xff] %vm595_vm4, %v946_v3  ;;  %2081 = vmatmul.msk.f32.gmra.mxu2 %vm1189_vm12, %v1673_v10 }
 0x1e9   : > { %997 = vst.msk [vmem:[#allocation2 + $0x28] sm:$0xff] %vm629_vm5, %v979_v5  ;;  %1614 = vrot.lane.b32.xlu2 %v1374_v29, %s2208_s15 }
 0x1eb   : > { %v1611_v36 = vpop.permute.xlu2 %1610 }
 0x1ec   : > { %1649 = vrot.lane.b32.xlu1 %v1430_v16, %s2209_s30 }
 0x1ed   : > { %1157 = vrot.lane.b32.xlu0 %v1142_v39, %s2209_s30 }
 0x1ee   : > { %v1015_v43 = vpop.permute.xlu1 %1014 }
 0x1ef   : > { %1033 = vst.msk [vmem:[#allocation2 + $0x28] sm:$0xff] %vm666_vm6, %v1015_v43  ;;  %v1471_v44 = vpop.permute.xlu0 %1470 }
 0x1f0   : > { %1491 = vst.msk [vmem:[#allocation2 + $0x18] sm:$0xff] %vm629_vm5, %v1471_v44  ;;  %v1306_v44 = vpop.f32.mrf.mxu1 }
 0x1f1   : > { %1527 = vst.msk [vmem:[#allocation2 + $0x18] sm:$0xff] %vm666_vm6, %v1507_v42  ;;  %1387 = vrot.lane.b32.xlu2 %v3100_v53, %s2202_s8  ;;  %v1602_v42 = vrot.slane %v462_v37, 1 }
 0x1f3   : > { %v1646_v45 = vpop.permute.xlu2 %1645  ;;  %v1603_v50 = vsel %vm488_vm0, %v1601_v40, %v1602_v42 }
 0x1f4   : > { %1476 = vrot.lane.b32.xlu1 %v3161_v22, %s2204_s10 }
 0x1f5   : > { %1443 = vrot.lane.b32.xlu0 %v3116_v51, %s2203_s9  ;;  %v1235_v51 = vpop.f32.mrf.mxu0 }
 0x1f6   : > { %v1542_v47 = vpop.permute.xlu1 %1541  ;;  %v1304_v62 = vadd.f32 %v1303_v1, %v1235_v51 }
 0x1f7   : > { %1562 = vst.msk [vmem:[#allocation2 + $0x18] sm:$0xff] %vm702_vm7, %v1542_v47  ;;  %v1050_v48 = vpop.permute.xlu0 %1049 }
 0x1f8   : > { %1068 = vst.msk [vmem:[#allocation2 + $0x28] sm:$0xff] %vm702_vm7, %v1050_v48 }
 0x1f9   : > { %1101 = vst.msk [vmem:[#allocation2 + $0x28] sm:$0xff] %vm736_vm8, %v1083_v31  ;;  %1512 = vrot.lane.b32.xlu2 %v1374_v29, %s2205_s11 }
 0x1fb   : > { %v948_v53 = vpop.permute.xlu2 %947 }
 0x1fc   : > { %1580 = vrot.lane.b32.xlu1 %v459_v19, %s2207_s13 }
 0x1fd   : > { %1547 = vrot.lane.b32.xlu0 %v1430_v16, %s2206_s12 }
 0x1fe   : > { %v1119_v59 = vpop.permute.xlu1 %1118 }
 0x1ff   : > { %1137 = vst.msk [vmem:[#allocation2 + $0x28] sm:$0xff] %vm773_vm10, %v1119_v59  ;;  %v1575_v56 = vpop.permute.xlu0 %1574 }
 0x200   : > { %1595 = vst.msk [vmem:[#allocation2 + $0x18] sm:$0xff] %vm736_vm8, %v1575_v56 }
 0x201   : > { %1631 = vst.msk [vmem:[#allocation2 + $0x18] sm:$0xff] %vm773_vm10, %v1611_v36  ;;  %1616 = vrot.lane.b32.xlu2 %v1499_v63, %s2208_s15 }
 0x202   : > { %1666 = vst.msk [vmem:[#allocation2 + $0x18] sm:$0xff] %vm809_vm11, %v1646_v45 }
 0x203   : > { %v1473_v25 = vpop.permute.xlu2 %1472 }
 0x204   : > { %1389 = vrot.lane.b32.xlu1 %v1374_v29, %s2202_s8  ;;  %s2047_s8 = sshll.u32 %s3381_s18, 3 }
 0x205   : > { %1651 = vrot.lane.b32.xlu0 %v1534_v61, %s2209_s30  ;;  %v1729_v2 = vpop.f32.mrf.mxu2 }
 0x206   : > { %v1753_v4 = vadd.f32 %v1729_v2, %v1304_v62  ;;  %v1154_v5 = vpop.permute.xlu1 %1153 }
 0x207   : > { %1172 = vst.msk [vmem:[#allocation2 + $0x28] sm:$0xff] %vm809_vm11, %v1154_v5  ;;  %v800_v54 = vpop.permute.xlu0 %799 }
 0x208   : > { %v1761_v11 = vmax.f32 %v1753_v4, 0.0  ;;  %817 = vst.msk [vmem:[#allocation2 + $0x38] sm:$0xff] %vm809_vm11, %v800_v54 }
 0x209   : > { %v1674_v38 = vld [vmem:[#allocation2 + $0x18] sm:$0xff]  ;;  %1445 = vrot.lane.b32.xlu2 %v1430_v16, %s2203_s9  ;;  %v1238_v16 = vpop.f32.mrf.mxu0  ;;  %s2048_s9 = sshll.u32 %s3375_s19, 6 }
 0x20a   : > { %2082 = vmatmul.msk.f32.gmra.mxu2 %vm1189_vm12, %v1674_v38  ;;  %2088 = vmatmul.msk.f32.vlgmr.msra.gmra.mxu3 %vm463_vm2, %v1761_v11  ;;  %v1307_v45 = vadd.f32 %v1306_v44, %v1238_v16  ;;  %v2153_v44 = vld [vmem:[%s2548_s29 + $0x28] sm:$0x3] }
 0x20b   : > { %v1052_v15 = vpop.permute.xlu2 %1051 }
 0x20c   : > { %1514 = vrot.lane.b32.xlu1 %v1499_v63, %s2205_s11 }
 0x20d   : > { %1478 = vrot.lane.b32.xlu0 %v459_v19, %s2204_s10  ;;  %s340_s10 = sadd.s32 %s2048_s9, %s2047_s8 }
 0x20e   : > { %v1384_v9 = vpop.permute.xlu1 %1383  ;;  %v1180_v14 = vld [vmem:[#allocation2 + $0x28] sm:$0xff]  ;;  %s2049_s18 = sshll.u32 %s340_s10, 3 }
 0x20f   : > { %1403 = vst.msk [vmem:[#allocation2 + $0x20] sm:$0xff] %vm537_vm3, %v1384_v9  ;;  %v892_v12 = vpop.permute.xlu0 %891  ;;  %2061 = vmatmul.msk.f32.gmra.mxu0 %vm1189_vm12, %v1180_v14  ;;  %v825_v21 = vld [vmem:[#allocation2 + $0x38] sm:$0xff] }
 0x210   : > { %909 = vst.msk [vmem:[#allocation2 + $0x30] sm:$0xff] %vm537_vm3, %v892_v12  ;;  %2072 = vmatmul.msk.f32.gmra.mxu1 %vm1189_vm12, %v825_v21 }
 0x211   : > { %965 = vst.msk [vmem:[#allocation2 + $0x30] sm:$0xff] %vm595_vm4, %v948_v53  ;;  %1549 = vrot.lane.b32.xlu2 %v1534_v61, %s2206_s12  ;;  %v1241_v5 = vpop.f32.mrf.mxu0  ;;  %s3298_s12 = scalar_lea.vmem %s3363_s5, %s2049_s18 }
 0x212   : > { %1332 = vst.msk [vmem:[#allocation2 + $0x28] sm:$0xff] %vm463_vm2, %v3007_v17  ;;  %v1638_v17 = vsel %vm546_vm1, %v1636_v23, %v1637_v27 }
 0x213   : > { %838 = vst.msk [vmem:[#allocation2 + $0x38] sm:$0xff] %vm463_vm2, %v2986_v49  ;;  %v1577_v18 = vpop.permute.xlu2 %1576 }
 0x214   : > { %1618 = vrot.lane.b32.xlu1 %v1603_v50, %s2208_s15 }
 0x215   : > { %1582 = vrot.lane.b32.xlu0 %v461_v13, %s2207_s13 }
 0x216   : > { %v981_v6 = vpop.permute.xlu1 %980 }
 0x217   : > { %998 = vst.msk [vmem:[#allocation2 + $0x30] sm:$0xff] %vm629_vm5, %v981_v6  ;;  %v1440_v28 = vpop.permute.xlu0 %1439 }
 0x218   : > { %1459 = vst.msk [vmem:[#allocation2 + $0x20] sm:$0xff] %vm595_vm4, %v1440_v28 }
 0x219   : > { %1492 = vst.msk [vmem:[#allocation2 + $0x20] sm:$0xff] %vm629_vm5, %v1473_v25  ;;  %1653 = vrot.lane.b32.xlu2 %v1638_v17, %s2209_s30  ;;  %v1309_v25 = vpop.f32.mrf.mxu1  ;;  %v2151_v17 = vld [vmem:[%s2548_s29 + $0x18] sm:$0x3] }
 0x21a   : > { %v1310_v11 = vadd.f32 %v1309_v25, %v1241_v5 }
 0x21b   : > { %v1156_v31 = vpop.permute.xlu2 %1155 }
 0x21e   : > { %v1509_v49 = vpop.permute.xlu1 %1508 }
 0x21f   : > { %1528 = vst.msk [vmem:[#allocation2 + $0x20] sm:$0xff] %vm666_vm6, %v1509_v49  ;;  %v1017_v7 = vpop.permute.xlu0 %1016  ;;  %v1855_v49 = vrot.slane %v2151_v17, 1 }
 0x220   : > { %1034 = vst.msk [vmem:[#allocation2 + $0x30] sm:$0xff] %vm666_vm6, %v1017_v7 }
 0x221   : > { %1069 = vst.msk [vmem:[#allocation2 + $0x30] sm:$0xff] %vm702_vm7, %v1052_v15  ;;  %v1312_v7 = vpop.f32.mrf.mxu1 }
 0x223   : > { %v1386_v33 = vpop.permute.xlu2 %1385 }
 0x224   : > { %1404 = vst.msk [vmem:[#allocation2 + $0x28] sm:$0xff] %vm537_vm3, %v1386_v33 }
 0x226   : > { %v1085_v32 = vpop.permute.xlu1 %1084 }
 0x227   : > { %1102 = vst.msk [vmem:[#allocation2 + $0x30] sm:$0xff] %vm736_vm8, %v1085_v32  ;;  %v1544_v3 = vpop.permute.xlu0 %1543 }
 0x228   : > { %1563 = vst.msk [vmem:[#allocation2 + $0x20] sm:$0xff] %vm702_vm7, %v1544_v3 }
 0x229   : > { %1596 = vst.msk [vmem:[#allocation2 + $0x20] sm:$0xff] %vm736_vm8, %v1577_v18  ;;  %v2150_v18 = vld [vmem:[%s2548_s29 + $0x10] sm:$0xff] }
 0x22a   : > { %v1854_v28 = vrot.slane %v2150_v18, 1 }
 0x22b   : > { %v983_v29 = vpop.permute.xlu2 %982 }
 0x22c   : > { %v1856_v33 = vsel %vm488_vm0, %v1854_v28, %v1855_v49  ;;  %v2159_v28 = vld [vmem:[%s2548_s29 + $0x58] sm:$0x3] }
 0x22d   : > { %v1867_v17 = vrot.slane %v2159_v28, 1 }
 0x22e   : > { %v1613_v10 = vpop.permute.xlu1 %1612 }
 0x22f   : > { %1632 = vst.msk [vmem:[#allocation2 + $0x20] sm:$0xff] %vm773_vm10, %v1613_v10  ;;  %v1121_v34 = vpop.permute.xlu0 %1120 }
 0x230   : > { %1138 = vst.msk [vmem:[#allocation2 + $0x30] sm:$0xff] %vm773_vm10, %v1121_v34 }
 0x231   : > { %1173 = vst.msk [vmem:[#allocation2 + $0x30] sm:$0xff] %vm809_vm11, %v1156_v31 }
 0x233   : > { %v1511_v36 = vpop.permute.xlu2 %1510 }
 0x235   : > { %v1244_v31 = vpop.f32.mrf.mxu0 }
 0x236   : > { %v894_v39 = vpop.permute.xlu1 %893  ;;  %v1313_v32 = vadd.f32 %v1312_v7, %v1244_v31 }
 0x237   : > { %910 = vst.msk [vmem:[#allocation2 + $0x38] sm:$0xff] %vm537_vm3, %v894_v39  ;;  %v1648_v43 = vpop.permute.xlu0 %1647 }
 0x238   : > { %1667 = vst.msk [vmem:[#allocation2 + $0x20] sm:$0xff] %vm809_vm11, %v1648_v43  ;;  %v1181_v35 = vld [vmem:[#allocation2 + $0x30] sm:$0xff] }
 0x239   : > { %2062 = vmatmul.msk.f32.gmra.mxu0 %vm1189_vm12, %v1181_v35  ;;  %1333 = vst.msk [vmem:[#allocation2 + $0x30] sm:$0xff] %vm463_vm2, %v3085_v30  ;;  %v1858_v35 = vrot.slane %v2153_v44, 1 }
 0x23a   : > { %v1732_v47 = vpop.f32.mrf.mxu2 }
 0x23b   : > { %v1754_v48 = vadd.f32 %v1732_v47, %v1307_v45  ;;  %v1087_v58 = vpop.permute.xlu2 %1086 }
 0x23d   : > { %v1762_v57 = vmax.f32 %v1754_v48, 0.0  ;;  %v1315_v48 = vpop.f32.mrf.mxu1 }
 0x23e   : > { %v1442_v19 = vpop.permute.xlu1 %1441 }
 0x23f   : > { %1460 = vst.msk [vmem:[#allocation2 + $0x28] sm:$0xff] %vm595_vm4, %v1442_v19  ;;  %v950_v53 = vpop.permute.xlu0 %949  ;;  %v1675_v59 = vld [vmem:[#allocation2 + $0x20] sm:$0xff]  ;;  %2089 = vmatmul.msk.f32.gmra.mxu3 %vm463_vm2, %v1762_v57 }
 0x240   : > { %966 = vst.msk [vmem:[#allocation2 + $0x38] sm:$0xff] %vm595_vm4, %v950_v53  ;;  %2083 = vmatmul.msk.f32.gmra.mxu2 %vm1189_vm12, %v1675_v59 }
 0x241   : > { %999 = vst.msk [vmem:[#allocation2 + $0x38] sm:$0xff] %vm629_vm5, %v983_v29 }
 0x243   : > { %v1615_v41 = vpop.permute.xlu2 %1614 }
 0x246   : > { %v1019_v60 = vpop.permute.xlu1 %1018 }
 0x247   : > { %1035 = vst.msk [vmem:[#allocation2 + $0x38] sm:$0xff] %vm666_vm6, %v1019_v60  ;;  %v1475_v30 = vpop.permute.xlu0 %1474 }
 0x248   : > { %1493 = vst.msk [vmem:[#allocation2 + $0x28] sm:$0xff] %vm629_vm5, %v1475_v30  ;;  %v1318_v30 = vpop.f32.mrf.mxu1 }
 0x249   : > { %1529 = vst.msk [vmem:[#allocation2 + $0x28] sm:$0xff] %vm666_vm6, %v1511_v36  ;;  %v2152_v36 = vld [vmem:[%s2548_s29 + $0x20] sm:$0xff] }
 0x24a   : > { %v1857_v43 = vrot.slane %v2152_v36, 1  ;;  %v1873_v36 = vrot.slane %v2981_v0, 1 }
 0x24b   : > { %v1388_v56 = vpop.permute.xlu2 %1387 }
 0x24c   : > { %1405 = vst.msk [vmem:[#allocation2 + $0x30] sm:$0xff] %vm537_vm3, %v1388_v56  ;;  %v1859_v47 = vsel %vm488_vm0, %v1857_v43, %v1858_v35 }
 0x24e   : > { %v1546_v55 = vpop.permute.xlu1 %1545 }
 0x24f   : > { %1564 = vst.msk [vmem:[#allocation2 + $0x28] sm:$0xff] %vm702_vm7, %v1546_v55  ;;  %v1054_v26 = vpop.permute.xlu0 %1053 }
 0x250   : > { %1070 = vst.msk [vmem:[#allocation2 + $0x38] sm:$0xff] %vm702_vm7, %v1054_v26 }
 0x251   : > { %1103 = vst.msk [vmem:[#allocation2 + $0x38] sm:$0xff] %vm736_vm8, %v1087_v58 }
 0x253   : > { %v1513_v62 = vpop.permute.xlu2 %1512 }
 0x256   : > { %v1123_v51 = vpop.permute.xlu1 %1122 }
 0x257   : > { %1139 = vst.msk [vmem:[#allocation2 + $0x38] sm:$0xff] %vm773_vm10, %v1123_v51  ;;  %v1579_v61 = vpop.permute.xlu0 %1578  ;;  %v1247_v45 = vpop.f32.mrf.mxu0 }
 0x258   : > { %1597 = vst.msk [vmem:[#allocation2 + $0x28] sm:$0xff] %vm736_vm8, %v1579_v61  ;;  %v1316_v57 = vadd.f32 %v1315_v48, %v1247_v45  ;;  %v2154_v61 = vld [vmem:[%s2548_s29 + $0x30] sm:$0xff]  ;;  %v1875_v45 = vrot.slane %v3075_v24, 1 }
 0x259   : > { %1633 = vst.msk [vmem:[#allocation2 + $0x28] sm:$0xff] %vm773_vm10, %v1615_v41 }
 0x25b   : > { %v1617_v54 = vpop.permute.xlu2 %1616 }
 0x25e   : > { %v1650_v63 = vpop.permute.xlu1 %1649 }
 0x25f   : > { %1668 = vst.msk [vmem:[#allocation2 + $0x28] sm:$0xff] %vm809_vm11, %v1650_v63  ;;  %v1158_v1 = vpop.permute.xlu0 %1157  ;;  %v1860_v63 = vrot.slane %v2154_v61, 1 }
 0x260   : > { %1174 = vst.msk [vmem:[#allocation2 + $0x38] sm:$0xff] %vm809_vm11, %v1158_v1  ;;  %v2155_v1 = vld [vmem:[%s2548_s29 + $0x38] sm:$0x3] }
 0x263   : > { %v1446_v9 = vpop.permute.xlu2 %1445 }
 0x266   : > { %v1477_v2 = vpop.permute.xlu1 %1476  ;;  %v1676_v4 = vld [vmem:[#allocation2 + $0x28] sm:$0xff] }
 0x267   : > { %v1444_v20 = vpop.permute.xlu0 %1443  ;;  %v1182_v52 = vld [vmem:[#allocation2 + $0x38] sm:$0xff]  ;;  %2084 = vmatmul.msk.f32.gmra.mxu2 %vm1189_vm12, %v1676_v4 }
 0x268   : > { %1461 = vst.msk [vmem:[#allocation2 + $0x30] sm:$0xff] %vm595_vm4, %v1444_v20  ;;  %2063 = vmatmul.msk.f32.gmra.mxu0 %vm1189_vm12, %v1182_v52  ;;  %v1321_v52 = vpop.f32.mrf.mxu1 }
 0x269   : > { %1494 = vst.msk [vmem:[#allocation2 + $0x30] sm:$0xff] %vm629_vm5, %v1477_v2 }
 0x26a   : > { %1334 = vst.msk [vmem:[#allocation2 + $0x38] sm:$0xff] %vm463_vm2, %v3161_v22 }
 0x26b   : > { %1530 = vst.msk [vmem:[#allocation2 + $0x30] sm:$0xff] %vm666_vm6, %v1513_v62  ;;  %v1735_v38 = vpop.f32.mrf.mxu2  ;;  %v1550_v15 = vpop.permute.xlu2 %1549  ;;  %v1861_v62 = vrot.slane %v2155_v1, 1 }
 0x26c   : > { %v1755_v13 = vadd.f32 %v1735_v38, %v1310_v11 }
 0x26d   : > { %v1862_v2 = vsel %vm488_vm0, %v1860_v63, %v1861_v62 }
 0x26e   : > { %v1763_v37 = vmax.f32 %v1755_v13, 0.0  ;;  %v1581_v40 = vpop.permute.xlu1 %1580  ;;  %v2156_v13 = vld [vmem:[%s2548_s29 + $0x40] sm:$0xff] }
 0x26f   : > { %v1548_v42 = vpop.permute.xlu0 %1547 }
 0x270   : > { %1565 = vst.msk [vmem:[#allocation2 + $0x30] sm:$0xff] %vm702_vm7, %v1548_v42  ;;  %2090 = vmatmul.msk.f32.gmra.mxu3 %vm463_vm2, %v1763_v37  ;;  %v1863_v37 = vrot.slane %v2156_v13, 1 }
 0x271   : > { %1598 = vst.msk [vmem:[#allocation2 + $0x30] sm:$0xff] %vm736_vm8, %v1581_v40  ;;  %v2157_v40 = vld [vmem:[%s2548_s29 + $0x48] sm:$0x3] }
 0x272   : > { %1634 = vst.msk [vmem:[#allocation2 + $0x30] sm:$0xff] %vm773_vm10, %v1617_v54  ;;  %v1864_v42 = vrot.slane %v2157_v40, 1 }
 0x273   : > { %v1654_v6 = vpop.permute.xlu2 %1653 }
 0x276   : > { %v1390_v14 = vpop.permute.xlu1 %1389 }
 0x277   : > { %v1652_v22 = vpop.permute.xlu0 %1651  ;;  %1406 = vst.msk [vmem:[#allocation2 + $0x38] sm:$0xff] %vm537_vm3, %v1390_v14 }
 0x278   : > { %1669 = vst.msk [vmem:[#allocation2 + $0x30] sm:$0xff] %vm809_vm11, %v1652_v22  ;;  %v1865_v22 = vsel %vm488_vm0, %v1863_v37, %v1864_v42 }
 0x279   : > { %1462 = vst.msk [vmem:[#allocation2 + $0x38] sm:$0xff] %vm595_vm4, %v1446_v9 }
 0x27e   : > { %v1515_v12 = vpop.permute.xlu1 %1514 }
 0x27f   : > { %v1479_v21 = vpop.permute.xlu0 %1478  ;;  %v1677_v50 = vld [vmem:[#allocation2 + $0x30] sm:$0xff] }
 0x280   : > { %1495 = vst.msk [vmem:[#allocation2 + $0x38] sm:$0xff] %vm629_vm5, %v1479_v21  ;;  %2085 = vmatmul.msk.f32.gmra.mxu2 %vm1189_vm12, %v1677_v50 }
 0x281   : > { %1531 = vst.msk [vmem:[#allocation2 + $0x38] sm:$0xff] %vm666_vm6, %v1515_v12 }
 0x282   : > { %1566 = vst.msk [vmem:[#allocation2 + $0x38] sm:$0xff] %vm702_vm7, %v1550_v15 }
 0x286   : > { %v1619_v23 = vpop.permute.xlu1 %1618 }
 0x287   : > { %v1583_v27 = vpop.permute.xlu0 %1582 }
 0x288   : > { %1599 = vst.msk [vmem:[#allocation2 + $0x38] sm:$0xff] %vm736_vm8, %v1583_v27 }
 0x289   : > { %1635 = vst.msk [vmem:[#allocation2 + $0x38] sm:$0xff] %vm773_vm10, %v1619_v23 }
 0x28a   : > { %1670 = vst.msk [vmem:[#allocation2 + $0x38] sm:$0xff] %vm809_vm11, %v1654_v6  ;;  %v2158_v6 = vld [vmem:[%s2548_s29 + $0x50] sm:$0xff] }
 0x28b   : > { %v1866_v18 = vrot.slane %v2158_v6, 1 }
 0x28c   : > { %v1250_v41 = vpop.f32.mrf.mxu0 }
 0x28d   : > { %v1738_v3 = vpop.f32.mrf.mxu2  ;;  %v1814_v29 = vpop.f32.mrf.mxu3  ;;  %v1319_v55 = vadd.f32 %v1318_v30, %v1250_v41  ;;  %v1868_v49 = vsel %vm488_vm0, %v1866_v18, %v1867_v17 }
 0x28e   : > { %v1756_v10 = vadd.f32 %v1738_v3, %v1313_v32  ;;  %v1886_v34 = vadd.f32 %v1856_v33, %v1814_v29  ;;  %v1324_v14 = vpop.f32.mrf.mxu1  ;;  %v2160_v32 = vld [vmem:[%s2548_s29 + $0x60] sm:$0xff]  ;;  %v2161_v3 = vld [vmem:[%s2548_s29 + $0x68] sm:$0x3] }
 0x28f   : > { %v1869_v33 = vrot.slane %v2160_v32, 1 }
 0x290   : > { %v1764_v16 = vmax.f32 %v1756_v10, 0.0  ;;  %1894 = vst.msk [vmem:[%s3298_s12] sm:$0xff] %vm463_vm2, %v1886_v34  ;;  %v1870_v10 = vrot.slane %v2161_v3, 1 }
 0x291   : > { %v1678_v39 = vld [vmem:[#allocation2 + $0x38] sm:$0xff] }
 0x292   : > { %2086 = vmatmul.msk.f32.gmra.mxu2 %vm1189_vm12, %v1678_v39  ;;  %2091 = vmatmul.msk.f32.gmra.mxu3 %vm463_vm2, %v1764_v16  ;;  %v1871_v29 = vsel %vm488_vm0, %v1869_v33, %v1870_v10  ;;  %v1872_v39 = vrot.slane %v2978_v46, 1 }
 0x294   : > { %v1874_v43 = vsel %vm488_vm0, %v1872_v39, %v1873_v36 }
 0x2b6   : > { %v1253_v20 = vpop.f32.mrf.mxu0 }
 0x2b7   : > { %v1322_v25 = vadd.f32 %v1321_v52, %v1253_v20 }
 0x2c2   : > { %v1817_v19 = vpop.f32.mrf.mxu3 }
 0x2c3   : > { %v1741_v58 = vpop.f32.mrf.mxu2  ;;  %v1887_v53 = vadd.f32 %v1859_v47, %v1817_v19  ;;  %v1876_v47 = vrot.slane %v3081_v8, 1 }
 0x2c4   : > { %v1757_v59 = vadd.f32 %v1741_v58, %v1316_v57 }
 0x2c5   : > { %1895 = vst.msk [vmem:[%s3298_s12 + $0x8] sm:$0xff] %vm463_vm2, %v1887_v53  ;;  %v1877_v48 = vsel %vm488_vm0, %v1875_v45, %v1876_v47 }
 0x2c6   : > { %v1765_v60 = vmax.f32 %v1757_v59, 0.0 }
 0x2c8   : > { %2092 = vmatmul.msk.f32.gmra.mxu3 %vm463_vm2, %v1765_v60 }
 0x2e5   : > { %v1256_v9 = vpop.f32.mrf.mxu0 }
 0x2e6   : > { %v1325_v15 = vadd.f32 %v1324_v14, %v1256_v9 }
 0x2ea   : > { %v1744_v26 = vpop.f32.mrf.mxu2 }
 0x2eb   : > { %v1758_v56 = vadd.f32 %v1744_v26, %v1319_v55 }
 0x2ed   : > { %v1766_v51 = vmax.f32 %v1758_v56, 0.0 }
 0x2ef   : > { %2093 = vmatmul.msk.f32.gmra.mxu3 %vm463_vm2, %v1766_v51 }
 0x2f3   : > { %v1820_v4 = vpop.f32.mrf.mxu3 }
 0x2f4   : > { %v1888_v5 = vadd.f32 %v1862_v2, %v1820_v4 }
 0x2f6   : > { %1896 = vst.msk [vmem:[%s3298_s12 + $0x10] sm:$0xff] %vm463_vm2, %v1888_v5 }
 0x303   : > { %v1747_v54 = vpop.f32.mrf.mxu2 }
 0x304   : > { %v1759_v11 = vadd.f32 %v1747_v54, %v1322_v25 }
 0x306   : > { %v1767_v38 = vmax.f32 %v1759_v11, 0.0 }
 0x308   : > { %2094 = vmatmul.msk.f32.gmra.mxu3 %vm463_vm2, %v1767_v38 }
 0x315   : > { %v1750_v12 = vpop.f32.mrf.mxu2  ;;  %v1823_v21 = vpop.f32.mrf.mxu3 }
 0x316   : > { %v1760_v50 = vadd.f32 %v1750_v12, %v1325_v15  ;;  %v1889_v23 = vadd.f32 %v1865_v22, %v1823_v21 }
 0x318   : > { %v1768_v27 = vmax.f32 %v1760_v50, 0.0  ;;  %1897 = vst.msk [vmem:[%s3298_s12 + $0x18] sm:$0xff] %vm463_vm2, %v1889_v23 }
 0x31a   : > { %2095 = vmatmul.msk.f32.gmra.mxu3 %vm463_vm2, %v1768_v27 }
 0x34b   : > { %v1826_v31 = vpop.f32.mrf.mxu3 }
 0x34c   : > { %v1890_v7 = vadd.f32 %v1868_v49, %v1826_v31 }
 0x34e   : > { %1898 = vst.msk [vmem:[%s3298_s12 + $0x20] sm:$0xff] %vm463_vm2, %v1890_v7 }
 0x372   : > { %v1829_v34 = vpop.f32.mrf.mxu3 }
 0x373   : > { %v1891_v16 = vadd.f32 %v1871_v29, %v1829_v34 }
 0x375   : > { %1899 = vst.msk [vmem:[%s3298_s12 + $0x28] sm:$0xff] %vm463_vm2, %v1891_v16 }
 0x38b   : > { %v1832_v44 = vpop.f32.mrf.mxu3 }
 0x38c   : > { %v1892_v35 = vadd.f32 %v1874_v43, %v1832_v44 }
 0x38e   : > { %1900 = vst.msk [vmem:[%s3298_s12 + $0x30] sm:$0xff] %vm463_vm2, %v1892_v35 }
 0x39d   : > { %v1835_v57 = vpop.f32.mrf.mxu3 }
 0x39e   : > { %v1893_v19 = vadd.f32 %v1877_v48, %v1835_v57 }
 0x3a0   : > { %1901 = vst.msk [vmem:[%s3298_s12 + $0x38] sm:$0xff] %vm463_vm2, %v1893_v19 }
 0x3a1 PF: > { %s15_s22 = sadd.s32 1, %s2200_s22   ;;  %s3364_s18 = smov %s2192_s20 }
 0x3a2   : > { %p12_p10 = scmp.ge.s32.totalorder %s15_s22, 18   ;;  %s3365_s19 = smov %s2196_s21 }
 0x3a3   : > { %s3366_s20 = smov %s3369_s23  ;;  %s3367_s21 = smov %s3373_s24 }
 0x3a4   :  { %14 = sbr.rel (!%p12_p10) target bundleno = 3 (0x3), region = 78 }

</bundles_post_ra>
